<compile_context>
chip_gen: v7x
topology: tpu7x:2x2x1
jax: 0.10.0
libtpu: 0.0.40
codegen_flags: <defaults>
</compile_context>

<pallas_src>
import math
import numpy as np
import jax
import jax.numpy as jnp
from jax.experimental import pallas as pl
from jax.experimental.pallas import tpu as pltpu


# -----------------------------------------------------------------------------
# Discrete fractional Fourier transform matrix (Candan/Kutay/Ozaktas, DFT-
# commuting matrix) — same construction torch-frft's `dfrft` uses.
# Host-side parameter setup (float64), NOT the hot path.
# -----------------------------------------------------------------------------
def dfrft_matrix(N: int, a: float) -> np.ndarray:
    n = np.arange(N)
    S = np.zeros((N, N), dtype=np.float64)
    S[n, n] = 2.0 * np.cos(2.0 * np.pi * n / N)
    S[n, (n + 1) % N] += 1.0
    S[n, (n - 1) % N] += 1.0

    even = (N % 2 == 0)
    r = N // 2
    inv_sqrt2 = 1.0 / np.sqrt(2.0)
    P = np.zeros((N, N), dtype=np.float64)
    P[0, 0] = 1.0
    for k in range(1, r + (0 if even else 1)):
        P[k, k] = inv_sqrt2
        P[k, N - k] = inv_sqrt2
    if even:
        P[r, r] = 1.0
    for k in range(r + 1, N):
        P[k, k] = -inv_sqrt2
        P[k, N - k] = inv_sqrt2

    CS = P @ S @ P.T
    ne = r + 1
    C2 = CS[:ne, :ne]
    S2 = CS[ne:, ne:]

    _, vc = np.linalg.eigh(C2)
    vc = vc[:, ::-1]
    if N - ne > 0:
        _, vs = np.linalg.eigh(S2)
        vs = vs[:, ::-1]
    else:
        vs = np.zeros((0, 0), dtype=np.float64)

    evecs_even = P.T @ np.concatenate([vc, np.zeros((N - ne, ne))], axis=0)
    evecs_odd = P.T @ np.concatenate([np.zeros((ne, N - ne)), vs], axis=0)

    if even:
        E = np.zeros((N, N + 1), dtype=np.float64)
        E[:, 0:N + 1:2] = evecs_even
        E[:, 1:N - 1:2] = evecs_odd
        E = np.delete(E, N - 1, axis=1)
    else:
        E = np.zeros((N, N), dtype=np.float64)
        E[:, 0:N:2] = evecs_even
        E[:, 1:N:2] = evecs_odd

    shift = 1 - (N % 2)
    idx = np.concatenate([np.arange(0, N - 1), [N - 1 + shift]]).astype(np.float64)
    evals = np.exp(-1j * (np.pi / 2.0) * a * idx)
    return (E * evals[None, :]) @ E.T            # E diag(evals) E^T


# -----------------------------------------------------------------------------
# Pallas kernel. One batch block per grid step; everything is lane-dense MXU
# matmuls over 2-D (rows, HW) slabs.
#   x_ref: (1 or 2, BB*Cp, HW)   packed [re(, im)] activation planes
#   k_ref: (4, HW, HW)           [KaT_re, KaT_im, KbT_re, KbT_im]
#                                Ka = kron(F_H(+a), F_W(+a)), Kb = kron(-a, -a)
#   w_ref: (2, BB*Op, BB*Cp)     block-diagonal [I_BB (x) W_re, I_BB (x) W_im]
#   b_ref: (2, BB*Op, 1)         bias (added after the channel-mix dot)
#   o_ref: (2, BB*Op, HW)        packed [re, im] output planes
# -----------------------------------------------------------------------------
def _make_kernel(complex_input: bool):
    def kernel(x_ref, k_ref, w_ref, b_ref, o_ref):
        mm = k_ref.dtype                      # matmul operand dtype (f32 / bf16)

        def dot(a, b):
            return jnp.dot(a, b, preferred_element_type=jnp.float32)

        ka_r, ka_i = k_ref[0], k_ref[1]
        kb_r, kb_i = k_ref[2], k_ref[3]
        w_r, w_i = w_ref[0], w_ref[1]
        b_r, b_i = b_ref[0], b_ref[1]         # (BB*Op, 1) f32, hoisted broadcast

        # ---- Stage 1: forward 2D DFrFT as one Kronecker-fused matmul --------
        x_r = x_ref[0].astype(mm)             # (BB*Cp, HW)
        if complex_input:
            x_i = x_ref[1].astype(mm)
            xf_r = dot(x_r, ka_r) - dot(x_i, ka_i)
            xf_i = dot(x_r, ka_i) + dot(x_i, ka_r)
        else:
            # Real input fast path: 2 dots instead of 4.
            xf_r = dot(x_r, ka_r)
            xf_i = dot(x_r, ka_i)

        # ---- Stage 2: complex 1x1 conv as ONE block-diagonal matmul + bias --
        # TODO(synk): `cn.Conv2d` is undefined in the source module; we assume
        # the standard complex affine convention out = W z + b.
        xf_r_m = xf_r.astype(mm)
        xf_i_m = xf_i.astype(mm)
        z_r = dot(w_r, xf_r_m) - dot(w_i, xf_i_m) + b_r     # (BB*Op, HW) f32
        z_i = dot(w_r, xf_i_m) + dot(w_i, xf_r_m) + b_i

        # ---- Stage 3: inverse 2D DFrFT as one Kronecker-fused matmul --------
        z_r_m = z_r.astype(mm)
        z_i_m = z_i.astype(mm)
        o_ref[0] = (dot(z_r_m, kb_r) - dot(z_i_m, kb_i)).astype(o_ref.dtype)
        o_ref[1] = (dot(z_r_m, kb_i) + dot(z_i_m, kb_r)).astype(o_ref.dtype)

    return kernel


def _auto_batch_block(B: int, Cp: int, *, target_rows: int = 256,
                      max_rows: int = 512) -> int:
    """Pick BB so BB*Cp fills the MXU rows (>=target when possible) while
    keeping >=2 grid steps (v7x has 2 TensorCores) and bounding VMEM."""
    divisors = [d for d in range(1, B + 1) if B % d == 0]
    feasible = [d for d in divisors if d * Cp <= max_rows] or [1]
    multi_step = [d for d in feasible if B // d >= 2]
    cands = multi_step if multi_step else feasible
    hitting = [d for d in cands if d * Cp >= target_rows]
    if hitting:
        return min(hitting)          # smallest BB that already fills the rows
    return max(cands)                # otherwise: as many rows as we can get


def spectral_fractional_conv2d(x, w_re, w_im, b_re, b_im, alpha, *,
                               batch_block=None, use_bf16_matmul=False,
                               interpret=False):
    """Forward pass of SpectralFractionalConv2d. Returns complex64 NCHW."""
    B, C, H, W = x.shape
    O = w_re.shape[0]
    HW = H * W
    if HW % 128 != 0:
        # TODO(synk): zero-pad H*W (and the Kron matrices) to a multiple of 128
        # for non-lane-aligned images.
        raise NotImplementedError("H*W must be a multiple of 128 (lane-dense tiling)")
    if HW > 1024:
        # TODO(synk): separable per-axis DFrFT path for large images — the Kron
        # fusion inflates FLOPs ~H-fold and the HW x HW matrices blow VMEM
        # (v7x only has 64 MiB).
        raise NotImplementedError("Kron-fused DFrFT path requires H*W <= 1024")

    # Pad channels/outputs to sublane multiples so every block is (8,128)-
    # aligned (dense views, unmasked stores) regardless of batch_block.
    Cp = max(8, -(-C // 8) * 8)
    Op = max(8, -(-O // 8) * 8)

    BB = batch_block if batch_block is not None else _auto_batch_block(B, Cp)
    assert B % BB == 0, "batch_block must divide batch"
    steps = B // BB
    M = BB * Cp                         # matmul M rows, stages 1/2(K)/...
    MO = BB * Op                        # matmul M rows, stages 2(out)/3

    complex_input = jnp.iscomplexobj(x)

    # --- activations: split complex, pad channels, flatten host-side ---------
    x_re = (jnp.real(x) if complex_input else x).astype(jnp.float32).reshape(B, C, HW)
    if Cp != C:
        x_re = jnp.pad(x_re, ((0, 0), (0, Cp - C), (0, 0)))
    planes = [x_re.reshape(B * Cp, HW)]
    if complex_input:
        x_im = jnp.imag(x).astype(jnp.float32).reshape(B, C, HW)
        if Cp != C:
            x_im = jnp.pad(x_im, ((0, 0), (0, Cp - C), (0, 0)))
        planes.append(x_im.reshape(B * Cp, HW))
    x_packed = jnp.stack(planes)                            # (1 or 2, B*Cp, HW)
    nplanes = x_packed.shape[0]

    # --- host-side transform matrices, fused via Kronecker product -----------
    Fwa = dfrft_matrix(W, float(alpha))      # applied along dim=-1
    Fha = dfrft_matrix(H, float(alpha))      # applied along dim=-2
    Fhb = dfrft_matrix(H, -float(alpha))
    Fwb = dfrft_matrix(W, -float(alpha))
    KaT = np.ascontiguousarray(np.kron(Fha, Fwa).T)   # row-flattened: y = x @ Ka^T
    KbT = np.ascontiguousarray(np.kron(Fhb, Fwb).T)

    mm_dtype = jnp.bfloat16 if use_bf16_matmul else jnp.float32
    kmats = jnp.asarray(
        np.stack([KaT.real, KaT.imag, KbT.real, KbT.imag]).astype(np.float32),
        dtype=mm_dtype)                                     # (4, HW, HW)

    # --- block-diagonal channel-mix weights: I_BB (x) W -----------------------
    w_re = jnp.asarray(w_re, jnp.float32)
    w_im = jnp.asarray(w_im, jnp.float32)
    wp_re = jnp.zeros((Op, Cp), jnp.float32).at[:O, :C].set(w_re)
    wp_im = jnp.zeros((Op, Cp), jnp.float32).at[:O, :C].set(w_im)
    eye_bb = jnp.eye(BB, dtype=jnp.float32)
    w_stack = jnp.stack([jnp.kron(eye_bb, wp_re),
                         jnp.kron(eye_bb, wp_im)]).astype(mm_dtype)  # (2, MO, M)

    bp_re = jnp.zeros((Op,), jnp.float32).at[:O].set(jnp.asarray(b_re, jnp.float32))
    bp_im = jnp.zeros((Op,), jnp.float32).at[:O].set(jnp.asarray(b_im, jnp.float32))
    b_stack = jnp.stack([jnp.tile(bp_re, BB),
                         jnp.tile(bp_im, BB)]).reshape(2, MO, 1)     # f32

    # --- BlockSpecs: lane-dense 2-D slabs, grid-invariant operands ------------
    x_spec = pl.BlockSpec((nplanes, M, HW), lambda gb: (0, gb, 0))
    # TODO(synk): on v7x, mark k/w/bias with pipeline_mode=pl.Buffered(1) once
    # single-buffering of grid-invariant operands is verified, to halve the K
    # stack's VMEM footprint at HW=1024.
    k_spec = pl.BlockSpec((4, HW, HW), lambda gb: (0, 0, 0))
    w_spec = pl.BlockSpec((2, MO, M), lambda gb: (0, 0, 0))
    bias_spec = pl.BlockSpec((2, MO, 1), lambda gb: (0, 0, 0))
    out_spec = pl.BlockSpec((2, MO, HW), lambda gb: (0, gb, 0))

    # --- VMEM budget (explicit: v5e default scoped VMEM is only 16 MiB) -------
    mm_bytes = jnp.dtype(mm_dtype).itemsize
    vmem_est = (2 * nplanes * M * HW * 4            # input, double-buffered
                + 2 * 2 * MO * HW * 4               # output, double-buffered
                + 2 * 4 * HW * HW * mm_bytes        # K stack
                + 2 * 2 * MO * M * mm_bytes         # weights
                + 2 * 2 * MO * 128 * 4              # bias (lane-padded)
                + 8 * max(M, MO) * HW * 4)          # intermediates (xf/z planes)
    vmem_limit = int(min(64 * 1024 * 1024,
                         max(32 * 1024 * 1024, int(vmem_est * 1.5))))

    # --- cost estimate for the XLA scheduler ----------------------------------
    n_s1 = 4 if complex_input else 2
    flops = steps * (n_s1 * 2 * M * HW * HW          # stage 1
                     + 4 * 2 * MO * M * HW           # stage 2
                     + 4 * 2 * MO * HW * HW)         # stage 3
    bytes_accessed = int(nplanes * B * Cp * HW * 4 + 2 * B * Op * HW * 4
                         + 4 * HW * HW * mm_bytes + 2 * MO * M * mm_bytes
                         + 2 * MO * 4)

    out_packed = pl.pallas_call(
        _make_kernel(complex_input),
        out_shape=jax.ShapeDtypeStruct((2, B * Op, HW), jnp.float32),
        grid_spec=pltpu.PrefetchScalarGridSpec(
            num_scalar_prefetch=0,
            grid=(steps,),
            in_specs=[x_spec, k_spec, w_spec, bias_spec],
            out_specs=out_spec),
        compiler_params=pltpu.CompilerParams(
            dimension_semantics=("parallel",),
            vmem_limit_bytes=vmem_limit),
        cost_estimate=pl.CostEstimate(flops=flops, transcendentals=0,
                                      bytes_accessed=bytes_accessed),
        interpret=interpret,
    )(x_packed, kmats, w_stack, b_stack)

    out = out_packed.reshape(2, B, Op, H, W)[:, :, :O]
    return out[0] + 1j * out[1]                      # complex64 NCHW


# -----------------------------------------------------------------------------
# Host (float64) reference of the identical math (separable form — independent
# of the Kron fusion used on device). Check only.
# -----------------------------------------------------------------------------
def reference_forward_np(x, Fwa, Fha, Fhb, Fwb, w_c, b_c):
    x = np.asarray(x, dtype=np.complex128)
    x1 = np.einsum('mw,bchw->bchm', Fwa, x)
    x2 = np.einsum('mh,bchw->bcmw', Fha, x1)
    x3 = np.einsum('oc,bchw->bohw', np.asarray(w_c, np.complex128), x2) \
         + np.asarray(b_c, np.complex128)[None, :, None, None]
    x4 = np.einsum('mh,bohw->bomw', Fhb, x3)
    x5 = np.einsum('mw,bohw->bohm', Fwb, x4)
    return x5


if __name__ == "__main__":
    B, Cin, Cout, H, W = 2, 4, 4, 16, 16
    alpha = 0.5
    # modes1 / modes2 exist on the PyTorch module but are never used in forward.

    key = jax.random.PRNGKey(0)
    kx, kxi, kwr, kwi, kbr, kbi = jax.random.split(key, 6)
    x = jax.random.normal(kx, (B, Cin, H, W), dtype=jnp.float32)

    scale = 1.0 / math.sqrt(Cin)
    w_re = jax.random.normal(kwr, (Cout, Cin), jnp.float32) * scale
    w_im = jax.random.normal(kwi, (Cout, Cin), jnp.float32) * scale
    b_re = jax.random.normal(kbr, (Cout,), jnp.float32) * 0.1
    b_im = jax.random.normal(kbi, (Cout,), jnp.float32) * 0.1

    # Host float64 reference pieces.
    Fwa = dfrft_matrix(W, alpha)
    Fha = dfrft_matrix(H, alpha)
    Fhb = dfrft_matrix(H, -alpha)
    Fwb = dfrft_matrix(W, -alpha)
    assert np.allclose(Fwa @ Fwb, np.eye(W), atol=1e-7)   # inverse consistency
    w_c = np.asarray(w_re) + 1j * np.asarray(w_im)
    b_c = np.asarray(b_re) + 1j * np.asarray(b_im)

    # ---- real-input fast path -------------------------------------------------
    out_r = spectral_fractional_conv2d(x, w_re, w_im, b_re, b_im, alpha)
    out_r = jax.block_until_ready(out_r)
    ref_r = reference_forward_np(np.asarray(x), Fwa, Fha, Fhb, Fwb, w_c, b_c)
    np.testing.assert_allclose(np.asarray(out_r), ref_r, rtol=2e-2, atol=2e-2)

    # ---- complex-input path (activations from a previous complex layer) -------
    x_im = jax.random.normal(kxi, (B, Cin, H, W), dtype=jnp.float32)
    xc = (x + 1j * x_im).astype(jnp.complex64)
    out_c = spectral_fractional_conv2d(xc, w_re, w_im, b_re, b_im, alpha)
    out_c = jax.block_until_ready(out_c)
    ref_c = reference_forward_np(np.asarray(xc), Fwa, Fha, Fhb, Fwb, w_c, b_c)
    np.testing.assert_allclose(np.asarray(out_c), ref_c, rtol=2e-2, atol=2e-2)

    print("KERNEL_OK")
</pallas_src>

<mosaic_0001>
module attributes {stable_mosaic.version = 11 : i64} {
  func.func @kernel(%arg0: i32, %arg1: memref<1x8x256xf32, #tpu.memory_space<vmem>>, %arg2: memref<4x256x256xf32, #tpu.memory_space<vmem>>, %arg3: memref<2x8x8xf32, #tpu.memory_space<vmem>>, %arg4: memref<2x8x1xf32, #tpu.memory_space<vmem>>, %arg5: memref<2x8x256xf32, #tpu.memory_space<vmem>>) attributes {dimension_semantics = [#tpu.dimension_semantics<parallel>], iteration_bounds = array<i64: 2>, scalar_prefetch = 0 : i64, scratch_operands = 0 : i64, tpu.core_type = #tpu.core_type<tc>, window_params = [{transform_indices = @transform_0, window_bounds = array<i64: 1, 8, 256>}, {pipeline_mode = #tpu.pipeline_mode<synchronous>, transform_indices = @transform_1, window_bounds = array<i64: 4, 256, 256>}, {pipeline_mode = #tpu.pipeline_mode<synchronous>, transform_indices = @transform_2, window_bounds = array<i64: 2, 8, 8>}, {pipeline_mode = #tpu.pipeline_mode<synchronous>, transform_indices = @transform_3, window_bounds = array<i64: 2, 8, 1>}, {transform_indices = @transform_4, window_bounds = array<i64: 2, 8, 256>}]} {
    %c0 = arith.constant 0 : index
    %c0_0 = arith.constant 0 : index
    %c0_1 = arith.constant 0 : index
    %0 = vector.load %arg2[%c0, %c0_0, %c0_1] : memref<4x256x256xf32, #tpu.memory_space<vmem>>, vector<1x256x256xf32>
    %1 = vector.shape_cast %0 : vector<1x256x256xf32> to vector<256x256xf32>
    %c1 = arith.constant 1 : index
    %c0_2 = arith.constant 0 : index
    %c0_3 = arith.constant 0 : index
    %2 = vector.load %arg2[%c1, %c0_2, %c0_3] : memref<4x256x256xf32, #tpu.memory_space<vmem>>, vector<1x256x256xf32>
    %3 = vector.shape_cast %2 : vector<1x256x256xf32> to vector<256x256xf32>
    %c2 = arith.constant 2 : index
    %c0_4 = arith.constant 0 : index
    %c0_5 = arith.constant 0 : index
    %4 = vector.load %arg2[%c2, %c0_4, %c0_5] : memref<4x256x256xf32, #tpu.memory_space<vmem>>, vector<1x256x256xf32>
    %5 = vector.shape_cast %4 : vector<1x256x256xf32> to vector<256x256xf32>
    %c3 = arith.constant 3 : index
    %c0_6 = arith.constant 0 : index
    %c0_7 = arith.constant 0 : index
    %6 = vector.load %arg2[%c3, %c0_6, %c0_7] : memref<4x256x256xf32, #tpu.memory_space<vmem>>, vector<1x256x256xf32>
    %7 = vector.shape_cast %6 : vector<1x256x256xf32> to vector<256x256xf32>
    %c0_8 = arith.constant 0 : index
    %c0_9 = arith.constant 0 : index
    %c0_10 = arith.constant 0 : index
    %8 = vector.load %arg3[%c0_8, %c0_9, %c0_10] : memref<2x8x8xf32, #tpu.memory_space<vmem>>, vector<1x8x8xf32>
    %9 = vector.shape_cast %8 : vector<1x8x8xf32> to vector<8x8xf32>
    %c1_11 = arith.constant 1 : index
    %c0_12 = arith.constant 0 : index
    %c0_13 = arith.constant 0 : index
    %10 = vector.load %arg3[%c1_11, %c0_12, %c0_13] : memref<2x8x8xf32, #tpu.memory_space<vmem>>, vector<1x8x8xf32>
    %11 = vector.shape_cast %10 : vector<1x8x8xf32> to vector<8x8xf32>
    %c0_14 = arith.constant 0 : index
    %c0_15 = arith.constant 0 : index
    %c0_16 = arith.constant 0 : index
    %12 = vector.load %arg4[%c0_14, %c0_15, %c0_16] : memref<2x8x1xf32, #tpu.memory_space<vmem>>, vector<1x8x1xf32>
    %13 = vector.shape_cast %12 : vector<1x8x1xf32> to vector<8x1xf32>
    %c1_17 = arith.constant 1 : index
    %c0_18 = arith.constant 0 : index
    %c0_19 = arith.constant 0 : index
    %14 = vector.load %arg4[%c1_17, %c0_18, %c0_19] : memref<2x8x1xf32, #tpu.memory_space<vmem>>, vector<1x8x1xf32>
    %15 = vector.shape_cast %14 : vector<1x8x1xf32> to vector<8x1xf32>
    %c0_20 = arith.constant 0 : index
    %c0_21 = arith.constant 0 : index
    %c0_22 = arith.constant 0 : index
    %16 = vector.load %arg1[%c0_20, %c0_21, %c0_22] : memref<1x8x256xf32, #tpu.memory_space<vmem>>, vector<1x8x256xf32>
    %17 = vector.shape_cast %16 : vector<1x8x256xf32> to vector<8x256xf32>
    %cst = arith.constant dense<0.000000e+00> : vector<8x256xf32>
    %18 = tpu.matmul %17, %1, %cst {dimension_numbers = #tpu.dot_dimension_numbers<[1], [0], [0], [1], [0, 0, 1, 1], [], []>} : vector<8x256xf32>, vector<256x256xf32>, vector<8x256xf32> -> vector<8x256xf32>
    %cst_23 = arith.constant dense<0.000000e+00> : vector<8x256xf32>
    %19 = tpu.matmul %17, %3, %cst_23 {dimension_numbers = #tpu.dot_dimension_numbers<[1], [0], [0], [1], [0, 0, 1, 1], [], []>} : vector<8x256xf32>, vector<256x256xf32>, vector<8x256xf32> -> vector<8x256xf32>
    %cst_24 = arith.constant dense<0.000000e+00> : vector<8x256xf32>
    %20 = tpu.matmul %9, %18, %cst_24 {dimension_numbers = #tpu.dot_dimension_numbers<[1], [0], [0], [1], [0, 0, 1, 1], [], []>} : vector<8x8xf32>, vector<8x256xf32>, vector<8x256xf32> -> vector<8x256xf32>
    %cst_25 = arith.constant dense<0.000000e+00> : vector<8x256xf32>
    %21 = tpu.matmul %11, %19, %cst_25 {dimension_numbers = #tpu.dot_dimension_numbers<[1], [0], [0], [1], [0, 0, 1, 1], [], []>} : vector<8x8xf32>, vector<8x256xf32>, vector<8x256xf32> -> vector<8x256xf32>
    %22 = arith.subf %20, %21 : vector<8x256xf32>
    %23 = vector.broadcast %13 : vector<8x1xf32> to vector<8x256xf32>
    %24 = arith.addf %22, %23 : vector<8x256xf32>
    %cst_26 = arith.constant dense<0.000000e+00> : vector<8x256xf32>
    %25 = tpu.matmul %9, %19, %cst_26 {dimension_numbers = #tpu.dot_dimension_numbers<[1], [0], [0], [1], [0, 0, 1, 1], [], []>} : vector<8x8xf32>, vector<8x256xf32>, vector<8x256xf32> -> vector<8x256xf32>
    %cst_27 = arith.constant dense<0.000000e+00> : vector<8x256xf32>
    %26 = tpu.matmul %11, %18, %cst_27 {dimension_numbers = #tpu.dot_dimension_numbers<[1], [0], [0], [1], [0, 0, 1, 1], [], []>} : vector<8x8xf32>, vector<8x256xf32>, vector<8x256xf32> -> vector<8x256xf32>
    %27 = arith.addf %25, %26 : vector<8x256xf32>
    %28 = vector.broadcast %15 : vector<8x1xf32> to vector<8x256xf32>
    %29 = arith.addf %27, %28 : vector<8x256xf32>
    %cst_28 = arith.constant dense<0.000000e+00> : vector<8x256xf32>
    %30 = tpu.matmul %24, %5, %cst_28 {dimension_numbers = #tpu.dot_dimension_numbers<[1], [0], [0], [1], [0, 0, 1, 1], [], []>} : vector<8x256xf32>, vector<256x256xf32>, vector<8x256xf32> -> vector<8x256xf32>
    %cst_29 = arith.constant dense<0.000000e+00> : vector<8x256xf32>
    %31 = tpu.matmul %29, %7, %cst_29 {dimension_numbers = #tpu.dot_dimension_numbers<[1], [0], [0], [1], [0, 0, 1, 1], [], []>} : vector<8x256xf32>, vector<256x256xf32>, vector<8x256xf32> -> vector<8x256xf32>
    %32 = arith.subf %30, %31 : vector<8x256xf32>
    %c0_30 = arith.constant 0 : index
    %c0_31 = arith.constant 0 : index
    %c0_32 = arith.constant 0 : index
    %33 = vector.load %arg5[%c0_30, %c0_31, %c0_32] : memref<2x8x256xf32, #tpu.memory_space<vmem>>, vector<1x8x256xf32>
    %34 = vector.shape_cast %33 : vector<1x8x256xf32> to vector<8x256xf32>
    %35 = vector.shape_cast %32 : vector<8x256xf32> to vector<1x8x256xf32>
    tpu.vector_store %arg5[%c0_30, %c0_31, %c0_32], %35 {strides = array<i32>} : memref<2x8x256xf32, #tpu.memory_space<vmem>>, vector<1x8x256xf32>,
    %cst_33 = arith.constant dense<0.000000e+00> : vector<8x256xf32>
    %36 = tpu.matmul %24, %7, %cst_33 {dimension_numbers = #tpu.dot_dimension_numbers<[1], [0], [0], [1], [0, 0, 1, 1], [], []>} : vector<8x256xf32>, vector<256x256xf32>, vector<8x256xf32> -> vector<8x256xf32>
    %cst_34 = arith.constant dense<0.000000e+00> : vector<8x256xf32>
    %37 = tpu.matmul %29, %5, %cst_34 {dimension_numbers = #tpu.dot_dimension_numbers<[1], [0], [0], [1], [0, 0, 1, 1], [], []>} : vector<8x256xf32>, vector<256x256xf32>, vector<8x256xf32> -> vector<8x256xf32>
    %38 = arith.addf %36, %37 : vector<8x256xf32>
    %c1_35 = arith.constant 1 : index
    %c0_36 = arith.constant 0 : index
    %c0_37 = arith.constant 0 : index
    %39 = vector.load %arg5[%c1_35, %c0_36, %c0_37] : memref<2x8x256xf32, #tpu.memory_space<vmem>>, vector<1x8x256xf32>
    %40 = vector.shape_cast %39 : vector<1x8x256xf32> to vector<8x256xf32>
    %41 = vector.shape_cast %38 : vector<8x256xf32> to vector<1x8x256xf32>
    tpu.vector_store %arg5[%c1_35, %c0_36, %c0_37], %41 {strides = array<i32>} : memref<2x8x256xf32, #tpu.memory_space<vmem>>, vector<1x8x256xf32>,
    return
  }
  func.func @transform_0(%arg0: i32) -> (i32, i32, i32) {
    %c0_i32 = arith.constant 0 : i32
    %c0_i32_0 = arith.constant 0 : i32
    %c0_i32_1 = arith.constant 0 : i32
    return %c0_i32, %arg0, %c0_i32_0 : i32, i32, i32
  }
  func.func @transform_1(%arg0: i32) -> (i32, i32, i32) {
    %c0_i32 = arith.constant 0 : i32
    %c0_i32_0 = arith.constant 0 : i32
    %c0_i32_1 = arith.constant 0 : i32
    %c0_i32_2 = arith.constant 0 : i32
    return %c0_i32, %c0_i32_0, %c0_i32_1 : i32, i32, i32
  }
  func.func @transform_2(%arg0: i32) -> (i32, i32, i32) {
    %c0_i32 = arith.constant 0 : i32
    %c0_i32_0 = arith.constant 0 : i32
    %c0_i32_1 = arith.constant 0 : i32
    %c0_i32_2 = arith.constant 0 : i32
    return %c0_i32, %c0_i32_0, %c0_i32_1 : i32, i32, i32
  }
  func.func @transform_3(%arg0: i32) -> (i32, i32, i32) {
    %c0_i32 = arith.constant 0 : i32
    %c0_i32_0 = arith.constant 0 : i32
    %c0_i32_1 = arith.constant 0 : i32
    %c0_i32_2 = arith.constant 0 : i32
    return %c0_i32, %c0_i32_0, %c0_i32_1 : i32, i32, i32
  }
  func.func @transform_4(%arg0: i32) -> (i32, i32, i32) {
    %c0_i32 = arith.constant 0 : i32
    %c0_i32_0 = arith.constant 0 : i32
    %c0_i32_1 = arith.constant 0 : i32
    return %c0_i32, %arg0, %c0_i32_0 : i32, i32, i32
  }
}

</mosaic_0001>

<bundles_post_ra>
// kernel: tpu_custom_call.1
= control target key start
LH: loop header
LB: loop body
LE: loop exit
PB: predicated region body
PF: predicated region fallthrough
CT: control target
= control target key end

     0   :  { %9 = vsyncpa [#allocation3], 0  ;;  %s2456_s0 = inlined_call_operand.hbm [shape: f32[1,16,256], index: 0, kind: input, shape index: {}]   ;;  %s2457_s1 = inlined_call_operand.hbm [shape: f32[4,256,256], index: 1, kind: input, shape index: {}]   ;;  %s2458_s2 = inlined_call_operand.vmem [shape: f32[2,8,8], index: 2, kind: input, shape index: {}]   ;;  %s2459_s3 = inlined_call_operand.vmem [shape: f32[2,8,1], index: 3, kind: input, shape index: {}]   ;;  %s2460_s4 = inlined_call_operand.hbm [shape: f32[2,16,256], index: 4, kind: output, shape index: {}]  }
   0x1   :  { %11 = vsyncpa [#allocation3 + $0x1], 0 }
   0x2   :  { %12 = vsyncpa [#allocation6], 0 }
   0x3   :  { %13 = vsyncpa [#allocation4], 0 }
   0x4   :  { %15 = vsyncpa [#allocation4 + $0x1], 0  ;;  %s1977_s15 = smov 0   ;;  %s1979_s16 = smov 0  }
   0x5   :  { %s1981_s17 = smov 0   ;;  %s1983_s18 = smov 0  }
   0x6 LB: > { %s1998_s19 = sadd.s32 4294967295, %s1940_s18   ;;  %s1333_s20 = sadd.s32 4294967294, %s1940_s18   ;;  %s1940_s18 = sphi %s1983_s18, %s2522_s18   ;;  %s1936_s17 = sphi %s1981_s17, %s2521_s17   ;;  %s1932_s16 = sphi %s1979_s16, %s2520_s16   ;;  %s1928_s15 = sphi %s1977_s15, %s2519_s15  }
   0x7   : > { %p41_p0 = scmp.ne.s32.totalorder %s1932_s16, %s1928_s15  ;;  %p2461_p1 = scmp.eq.s32.totalorder %s1998_s19, 0 }
   0x8   : > { %p134_p3 = scmp.eq.s32.totalorder %s1333_s20, 1  ;;  %p1334_p5 = scmp.ge.s32.totalorder %s1940_s18, 1 }
   0x9   : > { %p2007_p4 = por %p2461_p1, %p41_p0  ;;  %p141_p7 = scmp.lt.s32.totalorder %s1940_s18, 3 }
   0xa   : > { %p2012_p6 = por %p134_p3, %p41_p0  ;;  %s1942_s24 = smov [#allocation5]  }
   0xb   : > { %s2478_s21 = scalar_select %p2007_p4, 1, 0 }
   0xc   : > { %s2479_s22 = scalar_select %p2012_p6, 1, 0 }
   0xd   : > { %p2017_p8 = pnand %p1334_p5, %p141_p7  ;;  %s153_s25 = sshll.u32 %s1942_s24, 4  ;;  %s2021_s25 = int_to_ptr.vmem [resolvable:$true] %s153_s25 }
   0xe   : > { %s2033_s27 = sadd.s32 1, %s1940_s18   ;;  %s28_s28 = sadd.s32 1, %s1936_s17 }
   0xf   : > { %s2480_s23 = scalar_select %p2017_p8, 1, 0 }
  0x10   : > { %p1755_p9 = pneg %p2017_p8  ;;  %s25_s29 = ssub.s32 %s1940_s18, %s2033_s27 }
  0x11   : > { %s1812_s6 = scalar_lea.hbm %s2457_s1, 32768 }
  0x12   : > { %p2028_p11 = pnand %p1755_p9, %p2461_p1  ;;  %p1813_p12 = scmp.ne.s32.totalorder %s2457_s1, %s1812_s6 }
  0x13   : > { %p1819_p5 = scmp.lt.u32.totalorder %s1812_s6, %s2457_s1 }
  0x14   : > { %p1814_p13 = pneg %p2028_p11 }
  0x16   : > { %p1815_p0 = pnand %p1814_p13, %p1813_p12 }
  0x18   : > { %p1816_p3 = pneg %p1815_p0 }
  0x1a   : > { %p1821_p7 = pnand %p1819_p5, %p1816_p3 }
  0x1c   : > { %1824 = shalt.err (!%p1821_p7)
}
  0x1d   : > { %s1825_s11 = scalar_lea.vmem %s2021_s25, 32768  ;;  %p1833_p2 = scmp.lt.s32.totalorder %s2021_s25, %s2021_s25 }
  0x1e   : > { %p1826_p9 = scmp.ne.s32.totalorder %s2021_s25, %s1825_s11  ;;  %p1834_p6 = scmp.lt.s32.totalorder %s1825_s11, %s1825_s11 }
  0x20   : > { %p1828_p10 = pnand %p1826_p9, %p1814_p13  ;;  %p1835_p4 = por %p1834_p6, %p1833_p2 }
  0x22   : > { %p1829_p1 = pneg %p1828_p10 }
  0x24   : > { %p1836_p8 = pnand %p1835_p4, %p1829_p1 }
  0x26   : > { %1839 = shalt.err (!%p1836_p8)
}
  0x27   : > { %s1943_s12 = smov 256   ;;  %s1944_s13 = smov 16  }
  0x28   : > { %1758 = dma.hbm_to_vmem [thread:$0]  (!%p2028_p11), %s2457_s1, 32768, %s2021_s25, [#allocation6], %s1943_s12, %s1943_s12, %s1944_s13  }
  0x29   : > { %p26_p2 = scmp.eq.s32.totalorder %s25_s29, 0  ;;  %p35_p1 = scmp.ne.s32.totalorder %s1936_s17, %s1932_s16 }
  0x2a   : > { %p36_p4 = scmp.eq.s32.totalorder %s1940_s18, 0  ;;  %p1768_p6 = scmp.lt.s32.totalorder %s1940_s18, 2 }
  0x2b   : > { %s2064_s24 = scalar_select %p26_p2, %s1936_s17, %s28_s28  }
  0x2c   : > { %p37_p8 = por %p36_p4, %p35_p1  ;;  %p2482_p10 = scmp.eq.s32.totalorder %s1998_s19, 1 }
  0x2d   : > { %s173_s5 = sand.u32 1, %s1936_s17   ;;  %s1357_s6 = sshll.u32 %s1940_s18, 8 }
  0x2e   : > { %p2068_p12 = por %p2482_p10, %p35_p1  ;;  %s1337_s7 = sshll.u32 %s173_s5, 4 }
  0x2f   : > { %s2077_s9 = scalar_lea.hbm %s2456_s0, %s1357_s6  ;;  %s177_s25 = scalar_lea.vmem [#allocation2], %s1337_s7 }
  0x30   : > { %s185_s28 = sshll.u32 %s177_s25, 4  ;;  %p2079_p11 = pnand %p1768_p6, %p37_p8  ;;  %s2083_s28 = int_to_ptr.vmem [resolvable:$true] %s185_s28 }
  0x31   : > { %s174_s10 = scalar_lea.sflag [#allocation3], %s173_s5  ;;  %s1840_s11 = scalar_lea.hbm %s2077_s9, 256 }
  0x32   : > { %p1841_p13 = scmp.ne.s32.totalorder %s2077_s9, %s1840_s11  ;;  %p1842_p0 = pneg %p2079_p11 }
  0x33   : > { %s1845_s14 = scalar_lea.hbm %s2456_s0, 512  ;;  %p1846_p7 = scmp.lt.u32.totalorder %s2077_s9, %s2456_s0 }
  0x34   : > { %p1843_p3 = pnand %p1842_p0, %p1841_p13  ;;  %p1847_p9 = scmp.lt.u32.totalorder %s1845_s14, %s1840_s11 }
  0x35   : > { %p1849_p1 = scmp.lt.u32.totalorder %s1840_s11, %s2077_s9 }
  0x36   : > { %p1844_p5 = pneg %p1843_p3  ;;  %p1848_p2 = por %p1847_p9, %p1846_p7 }
  0x38   : > { %p1850_p4 = por %p1849_p1, %p1848_p2 }
  0x3a   : > { %p1851_p6 = pnand %p1850_p4, %p1844_p5 }
  0x3c   : > { %1854 = shalt.err (!%p1851_p6)
}
  0x3d   : > { %s1855_s5 = scalar_lea.vmem %s2083_s28, 256  ;;  %s1945_s7 = smov [#allocation2]  }
  0x3e   : > { %p1856_p8 = scmp.ne.s32.totalorder %s2083_s28, %s1855_s5  ;;  %s1860_s26 = sshll.u32 %s1945_s7, 4  ;;  %s1861_s26 = int_to_ptr.vmem [resolvable:$false] %s1860_s26 }
  0x3f   : > { %s1862_s8 = scalar_lea.vmem %s1861_s26, 512  ;;  %p1863_p3 = scmp.lt.s32.totalorder %s2083_s28, %s1861_s26 }
  0x40   : > { %p1858_p10 = pnand %p1856_p8, %p1842_p0  ;;  %p1864_p7 = scmp.lt.s32.totalorder %s1862_s8, %s1855_s5 }
  0x42   : > { %p1859_p13 = pneg %p1858_p10  ;;  %p1865_p9 = por %p1864_p7, %p1863_p3 }
  0x44   : > { %p1866_p2 = pnand %p1865_p9, %p1859_p13 }
  0x46   : > { %1869 = shalt.err (!%p1866_p2)
}
  0x47   : > { %1762 = dma.hbm_to_vmem [thread:$0]  (!%p2079_p11), %s2077_s9, 256, %s2083_s28, %s174_s10  }
  0x48   : > { %p2485_p5 = scmp.ne.s32.totalorder %s2480_s23, 0 }
  0x4a   : > { %194 = sbr.rel (%p2485_p5) target bundleno = 1009 (0x3f1), region = 36 }
  0x51   : > { %s2113_s25 = sand.u32 1, %s1932_s16   ;;  %p2486_p0 = scmp.ne.s32.totalorder %s2478_s21, 0 }
  0x52   : > { %s1341_s11 = sshll.u32 %s2113_s25, 4  ;;  %s197_s12 = scalar_lea.sflag [#allocation3], %s2113_s25 }
  0x53   : > { %s2117_s13 = scalar_lea.vmem [#allocation2], %s1341_s11 }
  0x54   : > { %1915 = dma.done.wait (%p2486_p0), %s197_s12, 256  }
  0x55   : > { %1917 = vsyncadd (%p2486_p0), %s197_s12, 4294967040  ;;  %p2487_p11 = scmp.eq.s32.totalorder %s1998_s19, 0 }
  0x57   : > { %1919 = dma.done.wait (%p2487_p11), [#allocation6], 32768   ;;  %p2488_p1 = pmov %p2487_p11 }
  0x58   : > { %v230_v0 = vld [vmem:[#allocation5 + $0x8] sm:$0xff]  ;;  %v232_v1 = vld [vmem:[#allocation5 + $0x18] sm:$0xff]  ;;  %v229_v2 = vld [vmem:[#allocation5] sm:$0xff]  ;;  %vm638_vm0 = vcmask 64512   ;;  %s1343_s6 = sshll.u32 %s2113_s25, 5  ;;  %s1358_s26 = sshll.u32 %s1998_s19, 8 }
  0x59   : > { %1921 = vsyncadd (%p2488_p1), [#allocation6], 4294934528  ;;  %v1359_v3 = vpack.c.bf16 %v232_v1, %v230_v0  ;;  %v231_v4 = vld [vmem:[#allocation5 + $0x10] sm:$0xff]  ;;  %v234_v5 = vld [vmem:[#allocation5 + $0x28] sm:$0xff]  ;;  %s228_s5 = scalar_lea.vmem [#allocation7], %s1343_s6  ;;  %s2412_s12 = scalar_lea.hbm %s2460_s4, %s1358_s26 }
  0x5a   : > { %v236_v6 = vld [vmem:[#allocation5 + $0x38] sm:$0xff]  ;;  %v1361_v7 = vpack.c.bf16 %v231_v4, %v229_v2  ;;  %v233_v9 = vld [vmem:[#allocation5 + $0x20] sm:$0xff]  ;;  %v235_v10 = vld [vmem:[#allocation5 + $0x30] sm:$0xff]  ;;  %s1250_s7 = sshll.u32 %s228_s5, 4  ;;  %s1948_s19 = smov [#allocation7]   ;;  %s2407_s7 = int_to_ptr.vmem [resolvable:$true] %s1250_s7 }
  0x5b   : > { %v1363_v8 = vpack.c.bf16 %v236_v6, %v234_v5  ;;  %v238_v11 = vld [vmem:[#allocation5 + $0x48] sm:$0xff]  ;;  %1360 = vmatprep.subr.bf16.mxu0 %v1359_v3  ;;  %v240_v12 = vld [vmem:[#allocation5 + $0x58] sm:$0xff]  ;;  %v1365_v13 = vpack.c.bf16 %v235_v10, %v233_v9  ;;  %v237_v15 = vld [vmem:[#allocation5 + $0x40] sm:$0xff]  ;;  %s1870_s21 = scalar_lea.vmem %s2407_s7, 512  ;;  %s1874_s23 = sshll.u32 %s1948_s19, 4  ;;  %s1875_s23 = int_to_ptr.vmem [resolvable:$false] %s1874_s23 }
  0x5c   : > { %1362 = vmatpush1.bf16.msra.mxu0 %v1361_v7  ;;  %v1367_v14 = vpack.c.bf16 %v240_v12, %v238_v11  ;;  %v239_v16 = vld [vmem:[#allocation5 + $0x50] sm:$0xff]  ;;  %v242_v17 = vld [vmem:[#allocation5 + $0x68] sm:$0xff]  ;;  %v244_v18 = vld [vmem:[#allocation5 + $0x78] sm:$0xff]  ;;  %p1871_p4 = scmp.ne.s32.totalorder %s2407_s7, %s1870_s21  ;;  %s1876_s9 = scalar_lea.vmem %s1875_s23, 1024 }
  0x5d   : > { %1364 = vmatprep.subr.bf16.mxu0 %v1363_v8  ;;  %v1369_v19 = vpack.c.bf16 %v239_v16, %v237_v15  ;;  %v1371_v20 = vpack.c.bf16 %v244_v18, %v242_v17  ;;  %v241_v21 = vld [vmem:[#allocation5 + $0x60] sm:$0xff]  ;;  %v243_v22 = vld [vmem:[#allocation5 + $0x70] sm:$0xff]  ;;  %v246_v23 = vld [vmem:[#allocation5 + $0x88] sm:$0xff]  ;;  %p1877_p10 = scmp.lt.s32.totalorder %s2407_s7, %s1875_s23  ;;  %p1878_p13 = scmp.lt.s32.totalorder %s1876_s9, %s1870_s21 }
  0x5e   : > { %v248_v24 = vld [vmem:[#allocation5 + $0x98] sm:$0xff]  ;;  %v1373_v25 = vpack.c.bf16 %v243_v22, %v241_v21  ;;  %v245_v27 = vld [vmem:[#allocation5 + $0x80] sm:$0xff]  ;;  %v247_v28 = vld [vmem:[#allocation5 + $0x90] sm:$0xff]  ;;  %p1872_p6 = pnand %p1871_p4, %p2068_p12 }
  0x5f   : > { %v1375_v26 = vpack.c.bf16 %v248_v24, %v246_v23  ;;  %v250_v29 = vld [vmem:[#allocation5 + $0xa8] sm:$0xff]  ;;  %v252_v30 = vld [vmem:[#allocation5 + $0xb8] sm:$0xff]  ;;  %v1377_v31 = vpack.c.bf16 %v247_v28, %v245_v27  ;;  %v249_v33 = vld [vmem:[#allocation5 + $0xa0] sm:$0xff]  ;;  %p1879_p3 = por %p1878_p13, %p1877_p10 }
  0x60   : > { %1366 = vmatpush1.bf16.msra.mxu0 %v1365_v13  ;;  %v1379_v32 = vpack.c.bf16 %v252_v30, %v250_v29  ;;  %v251_v34 = vld [vmem:[#allocation5 + $0xb0] sm:$0xff]  ;;  %v254_v35 = vld [vmem:[#allocation5 + $0xc8] sm:$0xff]  ;;  %v256_v36 = vld [vmem:[#allocation5 + $0xd8] sm:$0xff]  ;;  %p1873_p8 = pneg %p1872_p6 }
  0x61   : > { %1368 = vmatprep.subr.bf16.mxu0 %v1367_v14  ;;  %v1381_v37 = vpack.c.bf16 %v251_v34, %v249_v33  ;;  %v1383_v38 = vpack.c.bf16 %v256_v36, %v254_v35  ;;  %v253_v39 = vld [vmem:[#allocation5 + $0xc0] sm:$0xff]  ;;  %v255_v40 = vld [vmem:[#allocation5 + $0xd0] sm:$0xff]  ;;  %v2128_v41 = vld [vmem:[%s2117_s13 + $0x8] sm:$0xff] }
  0x62   : > { %v258_v42 = vld [vmem:[#allocation5 + $0xe8] sm:$0xff]  ;;  %v260_v43 = vld [vmem:[#allocation5 + $0xf8] sm:$0xff]  ;;  %560 = vmatprep.mubr.f32.mxu0 %v2128_v41  ;;  %v1385_v44 = vpack.c.bf16 %v255_v40, %v253_v39  ;;  %v257_v46 = vld [vmem:[#allocation5 + $0xe0] sm:$0xff]  ;;  %p1880_p7 = pnand %p1879_p3, %p1873_p8 }
  0x63   : > { %v1387_v45 = vpack.c.bf16 %v260_v43, %v258_v42  ;;  %v259_v47 = vld [vmem:[#allocation5 + $0xf0] sm:$0xff]  ;;  %v262_v48 = vld [vmem:[#allocation5 + $0x108] sm:$0xff]  ;;  %v264_v49 = vld [vmem:[#allocation5 + $0x118] sm:$0xff] }
  0x64   : > { %1370 = vmatpush1.bf16.msra.mxu0 %v1369_v19  ;;  %v1389_v50 = vpack.c.bf16 %v259_v47, %v257_v46  ;;  %v1391_v51 = vpack.c.bf16 %v264_v49, %v262_v48  ;;  %v261_v52 = vld [vmem:[#allocation5 + $0x100] sm:$0xff]  ;;  %v263_v53 = vld [vmem:[#allocation5 + $0x110] sm:$0xff]  ;;  %v266_v54 = vld [vmem:[#allocation5 + $0x128] sm:$0xff] }
  0x65   : > { %1372 = vmatprep.subr.bf16.mxu0 %v1371_v20  ;;  %v268_v55 = vld [vmem:[#allocation5 + $0x138] sm:$0xff]  ;;  %v1393_v56 = vpack.c.bf16 %v263_v53, %v261_v52  ;;  %v265_v58 = vld [vmem:[#allocation5 + $0x120] sm:$0xff]  ;;  %v267_v59 = vld [vmem:[#allocation5 + $0x130] sm:$0xff] }
  0x66   : > { %v1395_v57 = vpack.c.bf16 %v268_v55, %v266_v54  ;;  %v270_v60 = vld [vmem:[#allocation5 + $0x148] sm:$0xff]  ;;  %v272_v61 = vld [vmem:[#allocation5 + $0x158] sm:$0xff]  ;;  %v1397_v62 = vpack.c.bf16 %v267_v59, %v265_v58  ;;  %v269_v0 = vld [vmem:[#allocation5 + $0x140] sm:$0xff] }
  0x67   : > { %v1399_v63 = vpack.c.bf16 %v272_v61, %v270_v60  ;;  %v271_v1 = vld [vmem:[#allocation5 + $0x150] sm:$0xff]  ;;  %v274_v2 = vld [vmem:[#allocation5 + $0x168] sm:$0xff]  ;;  %v276_v3 = vld [vmem:[#allocation5 + $0x178] sm:$0xff] }
  0x68   : > { %1374 = vmatpush1.bf16.msra.mxu0 %v1373_v25  ;;  %v1401_v4 = vpack.c.bf16 %v271_v1, %v269_v0  ;;  %v1403_v5 = vpack.c.bf16 %v276_v3, %v274_v2  ;;  %v273_v6 = vld [vmem:[#allocation5 + $0x160] sm:$0xff]  ;;  %v275_v7 = vld [vmem:[#allocation5 + $0x170] sm:$0xff]  ;;  %v278_v8 = vld [vmem:[#allocation5 + $0x188] sm:$0xff] }
  0x69   : > { %1376 = vmatprep.subr.bf16.mxu0 %v1375_v26  ;;  %v280_v9 = vld [vmem:[#allocation5 + $0x198] sm:$0xff]  ;;  %v1405_v10 = vpack.c.bf16 %v275_v7, %v273_v6  ;;  %v277_v12 = vld [vmem:[#allocation5 + $0x180] sm:$0xff]  ;;  %v279_v13 = vld [vmem:[#allocation5 + $0x190] sm:$0xff] }
  0x6a   : > { %v1407_v11 = vpack.c.bf16 %v280_v9, %v278_v8  ;;  %v282_v14 = vld [vmem:[#allocation5 + $0x1a8] sm:$0xff]  ;;  %v284_v15 = vld [vmem:[#allocation5 + $0x1b8] sm:$0xff]  ;;  %v1409_v16 = vpack.c.bf16 %v279_v13, %v277_v12  ;;  %v281_v18 = vld [vmem:[#allocation5 + $0x1a0] sm:$0xff] }
  0x6b   : > { %v1411_v17 = vpack.c.bf16 %v284_v15, %v282_v14  ;;  %v283_v19 = vld [vmem:[#allocation5 + $0x1b0] sm:$0xff]  ;;  %v286_v20 = vld [vmem:[#allocation5 + $0x1c8] sm:$0xff]  ;;  %v288_v21 = vld [vmem:[#allocation5 + $0x1d8] sm:$0xff] }
  0x6c   : > { %1378 = vmatpush1.bf16.msra.mxu0 %v1377_v31  ;;  %v1413_v22 = vpack.c.bf16 %v283_v19, %v281_v18  ;;  %v1415_v23 = vpack.c.bf16 %v288_v21, %v286_v20  ;;  %v285_v24 = vld [vmem:[#allocation5 + $0x1c0] sm:$0xff]  ;;  %v287_v25 = vld [vmem:[#allocation5 + $0x1d0] sm:$0xff]  ;;  %v290_v26 = vld [vmem:[#allocation5 + $0x1e8] sm:$0xff] }
  0x6d   : > { %1380 = vmatprep.subr.bf16.mxu0 %v1379_v32  ;;  %v292_v27 = vld [vmem:[#allocation5 + $0x1f8] sm:$0xff]  ;;  %v1417_v28 = vpack.c.bf16 %v287_v25, %v285_v24  ;;  %v289_v30 = vld [vmem:[#allocation5 + $0x1e0] sm:$0xff]  ;;  %v291_v31 = vld [vmem:[#allocation5 + $0x1f0] sm:$0xff] }
  0x6e   : > { %v1419_v29 = vpack.c.bf16 %v292_v27, %v290_v26  ;;  %v295_v32 = vld [vmem:[#allocation5 + $0x208] sm:$0xff]  ;;  %v297_v33 = vld [vmem:[#allocation5 + $0x218] sm:$0xff]  ;;  %v1421_v34 = vpack.c.bf16 %v291_v31, %v289_v30  ;;  %v294_v36 = vld [vmem:[#allocation5 + $0x200] sm:$0xff] }
  0x6f   : > { %v1423_v35 = vpack.c.bf16 %v297_v33, %v295_v32  ;;  %v301_v39 = vld [vmem:[#allocation5 + $0x238] sm:$0xff]  ;;  %v2132_v40 = vld [vmem:[%s2117_s13] sm:$0xff]  ;;  %v303_v46 = vld [vmem:[#allocation5 + $0x248] sm:$0xff]  ;;  %s1237_s13 = scalar_lea.sflag [#allocation4], %s2113_s25 }
  0x70   : > { %1382 = vmatpush1.bf16.msra.mxu0 %v1381_v37  ;;  %v296_v37 = vld [vmem:[#allocation5 + $0x210] sm:$0xff]  ;;  %v305_v47 = vld [vmem:[#allocation5 + $0x258] sm:$0xff]  ;;  %v307_v52 = vld [vmem:[#allocation5 + $0x268] sm:$0xff] }
  0x71   : > { %1384 = vmatprep.subr.bf16.mxu0 %v1383_v38  ;;  %v299_v38 = vld [vmem:[#allocation5 + $0x228] sm:$0xff]  ;;  %v1425_v42 = vpack.c.bf16 %v296_v37, %v294_v36  ;;  %v1431_v49 = vpack.c.bf16 %v305_v47, %v303_v46  ;;  %v309_v53 = vld [vmem:[#allocation5 + $0x278] sm:$0xff]  ;;  %v314_v3 = vld [vmem:[#allocation5 + $0x2a0] sm:$0xff] }
  0x72   : > { %v1427_v43 = vpack.c.bf16 %v301_v39, %v299_v38  ;;  %v1435_v55 = vpack.c.bf16 %v309_v53, %v307_v52  ;;  %v311_v58 = vld [vmem:[#allocation5 + $0x288] sm:$0xff]  ;;  %v313_v59 = vld [vmem:[#allocation5 + $0x298] sm:$0xff]  ;;  %v318_v9 = vld [vmem:[#allocation5 + $0x2c0] sm:$0xff] }
  0x73   : > { %v1439_v61 = vpack.c.bf16 %v313_v59, %v311_v58  ;;  %v317_v0 = vld [vmem:[#allocation5 + $0x2b8] sm:$0xff]  ;;  %v322_v15 = vld [vmem:[#allocation5 + $0x2e0] sm:$0xff] }
  0x74   : > { %1386 = vmatpush1.bf16.msra.mxu0 %v1385_v44  ;;  %v298_v44 = vld [vmem:[#allocation5 + $0x220] sm:$0xff]  ;;  %v321_v6 = vld [vmem:[#allocation5 + $0x2d8] sm:$0xff] }
  0x75   : > { %1388 = vmatprep.subr.bf16.mxu0 %v1387_v45  ;;  %v300_v45 = vld [vmem:[#allocation5 + $0x230] sm:$0xff]  ;;  %v325_v12 = vld [vmem:[#allocation5 + $0x2f8] sm:$0xff]  ;;  %v326_v21 = vld [vmem:[#allocation5 + $0x300] sm:$0xff] }
  0x76   : > { %v1429_v48 = vpack.c.bf16 %v300_v45, %v298_v44  ;;  %v329_v18 = vld [vmem:[#allocation5 + $0x318] sm:$0xff]  ;;  %v330_v27 = vld [vmem:[#allocation5 + $0x320] sm:$0xff] }
  0x77   : > { %v333_v24 = vld [vmem:[#allocation5 + $0x338] sm:$0xff]  ;;  %v334_v33 = vld [vmem:[#allocation5 + $0x340] sm:$0xff] }
  0x78   : > { %1390 = vmatpush1.bf16.msra.mxu0 %v1389_v50  ;;  %v302_v50 = vld [vmem:[#allocation5 + $0x240] sm:$0xff]  ;;  %v337_v30 = vld [vmem:[#allocation5 + $0x358] sm:$0xff] }
  0x79   : > { %1392 = vmatprep.subr.bf16.mxu0 %v1391_v51  ;;  %v304_v51 = vld [vmem:[#allocation5 + $0x250] sm:$0xff]  ;;  %v341_v36 = vld [vmem:[#allocation5 + $0x378] sm:$0xff]  ;;  %v338_v39 = vld [vmem:[#allocation5 + $0x360] sm:$0xff] }
  0x7a   : > { %v1433_v54 = vpack.c.bf16 %v304_v51, %v302_v50  ;;  %v345_v44 = vld [vmem:[#allocation5 + $0x398] sm:$0xff]  ;;  %v342_v47 = vld [vmem:[#allocation5 + $0x380] sm:$0xff] }
  0x7b   : > { %v349_v50 = vld [vmem:[#allocation5 + $0x3b8] sm:$0xff]  ;;  %v346_v53 = vld [vmem:[#allocation5 + $0x3a0] sm:$0xff] }
  0x7c   : > { %1394 = vmatpush1.bf16.msra.mxu0 %v1393_v56  ;;  %v306_v56 = vld [vmem:[#allocation5 + $0x260] sm:$0xff] }
  0x7d   : > { %1396 = vmatprep.subr.bf16.mxu0 %v1395_v57  ;;  %v308_v57 = vld [vmem:[#allocation5 + $0x270] sm:$0xff]  ;;  %v350_v59 = vld [vmem:[#allocation5 + $0x3c0] sm:$0xff] }
  0x7e   : > { %v1437_v60 = vpack.c.bf16 %v308_v57, %v306_v56  ;;  %v353_v56 = vld [vmem:[#allocation5 + $0x3d8] sm:$0xff] }
  0x80   : > { %1398 = vmatpush1.bf16.msra.mxu0 %v1397_v62  ;;  %v310_v62 = vld [vmem:[#allocation5 + $0x280] sm:$0xff] }
  0x81   : > { %1400 = vmatprep.subr.bf16.mxu0 %v1399_v63  ;;  %v315_v63 = vld [vmem:[#allocation5 + $0x2a8] sm:$0xff] }
  0x82   : > { %v1443_v2 = vpack.c.bf16 %v317_v0, %v315_v63  ;;  %v354_v0 = vld [vmem:[#allocation5 + $0x3e0] sm:$0xff] }
  0x84   : > { %1402 = vmatpush1.bf16.msra.mxu0 %v1401_v4  ;;  %v316_v4 = vld [vmem:[#allocation5 + $0x2b0] sm:$0xff] }
  0x85   : > { %1404 = vmatprep.subr.bf16.mxu0 %v1403_v5  ;;  %v319_v5 = vld [vmem:[#allocation5 + $0x2c8] sm:$0xff]  ;;  %v1445_v7 = vpack.c.bf16 %v316_v4, %v314_v3  ;;  %v1946_v3 = vmov 0.0   ;;  %v491_v4 = vld [vmem:[%s2459_s3] sm:$0xff] }
  0x86   : > { %v1447_v8 = vpack.c.bf16 %v321_v6, %v319_v5  ;;  %706 = vmatprep.mubr.f32.mxu1 %v1946_v3  ;;  %v1947_v5 = vmov 0   ;;  %v1345_v6 = vld [vmem:[%s2459_s3 + $0x8] sm:$0xff] }
  0x87   : > { %1811 = vset.pattern.permute.xlu0 %v1947_v5  ;;  %v440_v5 = vld [vmem:[#allocation5 + $0x680] sm:$0xff] }
  0x88   : > { %1406 = vmatpush1.bf16.msra.mxu0 %v1405_v10  ;;  %v320_v10 = vld [vmem:[#allocation5 + $0x2d0] sm:$0xff]  ;;  %791 = vperm.xlu0 %1811, %v491_v4  }
  0x89   : > { %1408 = vmatprep.subr.bf16.mxu0 %v1407_v11  ;;  %v323_v11 = vld [vmem:[#allocation5 + $0x2e8] sm:$0xff]  ;;  %v1449_v13 = vpack.c.bf16 %v320_v10, %v318_v9  ;;  %v488_v9 = vld [vmem:[%s2458_s2] sm:$0xff] }
  0x8a   : > { %v1451_v14 = vpack.c.bf16 %v325_v12, %v323_v11  ;;  %v360_v10 = vld [vmem:[#allocation5 + $0x408] sm:$0xff]  ;;  %v362_v11 = vld [vmem:[#allocation5 + $0x418] sm:$0xff]  ;;  %v359_v12 = vld [vmem:[#allocation5 + $0x400] sm:$0xff] }
  0x8c   : > { %1410 = vmatpush1.bf16.msra.mxu0 %v1409_v16  ;;  %v324_v16 = vld [vmem:[#allocation5 + $0x2f0] sm:$0xff]  ;;  %940 = vperm.xlu0 %1811, %v1345_v6  }
  0x8d   : > { %1412 = vmatprep.subr.bf16.mxu0 %v1411_v17  ;;  %v327_v17 = vld [vmem:[#allocation5 + $0x308] sm:$0xff]  ;;  %v1453_v19 = vpack.c.bf16 %v324_v16, %v322_v15  ;;  %v427_v15 = vld [vmem:[#allocation5 + $0x618] sm:$0xff]  ;;  %v424_v16 = vld [vmem:[#allocation5 + $0x600] sm:$0xff] }
  0x8e   : > { %v1455_v20 = vpack.c.bf16 %v329_v18, %v327_v17  ;;  %v426_v17 = vld [vmem:[#allocation5 + $0x610] sm:$0xff]  ;;  %v364_v18 = vld [vmem:[#allocation5 + $0x428] sm:$0xff] }
  0x8f   : > { %v442_v6 = vld [vmem:[#allocation5 + $0x690] sm:$0xff] }
  0x90   : > { %1414 = vmatpush1.bf16.msra.mxu0 %v1413_v22  ;;  %v328_v22 = vld [vmem:[#allocation5 + $0x310] sm:$0xff] }
  0x91   : > { %1416 = vmatprep.subr.bf16.mxu0 %v1415_v23  ;;  %v331_v23 = vld [vmem:[#allocation5 + $0x328] sm:$0xff]  ;;  %v1457_v25 = vpack.c.bf16 %v328_v22, %v326_v21  ;;  %v431_v22 = vld [vmem:[#allocation5 + $0x638] sm:$0xff] }
  0x92   : > { %v1459_v26 = vpack.c.bf16 %v333_v24, %v331_v23  ;;  %v429_v21 = vld [vmem:[#allocation5 + $0x628] sm:$0xff]  ;;  %v2151_v24 = vpack.c.bf16 %v362_v11, %v360_v10  ;;  %v2207_v11 = vpack.c.bf16 %v442_v6, %v440_v5 }
  0x94   : > { %1418 = vmatpush1.bf16.msra.mxu0 %v1417_v28  ;;  %v332_v28 = vld [vmem:[#allocation5 + $0x330] sm:$0xff] }
  0x95   : > { %1420 = vmatprep.subr.bf16.mxu0 %v1419_v29  ;;  %v335_v29 = vld [vmem:[#allocation5 + $0x348] sm:$0xff]  ;;  %v1461_v31 = vpack.c.bf16 %v332_v28, %v330_v27  ;;  %v2157_v27 = vpack.c.bf16 %v426_v17, %v424_v16  ;;  %v363_v28 = vld [vmem:[#allocation5 + $0x420] sm:$0xff]  ;;  %v446_v17 = vld [vmem:[#allocation5 + $0x6b0] sm:$0xff] }
  0x96   : > { %v1463_v32 = vpack.c.bf16 %v337_v30, %v335_v29  ;;  %v365_v29 = vld [vmem:[#allocation5 + $0x430] sm:$0xff]  ;;  %v444_v16 = vld [vmem:[#allocation5 + $0x6a0] sm:$0xff] }
  0x98   : > { %1422 = vmatpush1.bf16.msra.mxu0 %v1421_v34  ;;  %v336_v34 = vld [vmem:[#allocation5 + $0x350] sm:$0xff] }
  0x99   : > { %1424 = vmatprep.subr.bf16.mxu0 %v1423_v35  ;;  %v339_v35 = vld [vmem:[#allocation5 + $0x368] sm:$0xff]  ;;  %v1465_v37 = vpack.c.bf16 %v336_v34, %v334_v33  ;;  %v430_v33 = vld [vmem:[#allocation5 + $0x630] sm:$0xff] }
  0x9a   : > { %v1467_v38 = vpack.c.bf16 %v341_v36, %v339_v35  ;;  %v368_v34 = vld [vmem:[#allocation5 + $0x448] sm:$0xff]  ;;  %v370_v35 = vld [vmem:[#allocation5 + $0x458] sm:$0xff] }
  0x9b   : > { %561 = vmatmul.mubr.f32.vlgmr.msra.gmra.mrb[0].mxu0 %v2132_v40  ;;  %v433_v36 = vld [vmem:[#allocation5 + $0x648] sm:$0xff] }
  0x9c   : > { %1426 = vmatpush1.bf16.msra.mxu0 %v1425_v42  ;;  %631 = vmatprep.mubr.f32.mxu0 %v2128_v41  ;;  %v312_v41 = vld [vmem:[#allocation5 + $0x290] sm:$0xff] }
  0x9d   : > { %1428 = vmatprep.subr.bf16.mxu0 %v1427_v43  ;;  %v1441_v1 = vpack.c.bf16 %v312_v41, %v310_v62  ;;  %v340_v42 = vld [vmem:[#allocation5 + $0x370] sm:$0xff]  ;;  %v343_v43 = vld [vmem:[#allocation5 + $0x388] sm:$0xff]  ;;  %v357_v62 = vld [vmem:[#allocation5 + $0x3f8] sm:$0xff] }
  0x9e   : > { %v1469_v45 = vpack.c.bf16 %v340_v42, %v338_v39  ;;  %v1471_v46 = vpack.c.bf16 %v345_v44, %v343_v43  ;;  %v367_v42 = vld [vmem:[#allocation5 + $0x440] sm:$0xff]  ;;  %v369_v43 = vld [vmem:[#allocation5 + $0x450] sm:$0xff]  ;;  %v2175_v44 = vpack.c.bf16 %v370_v35, %v368_v34 }
  0x9f   : > { %v448_v34 = vld [vmem:[#allocation5 + $0x6c0] sm:$0xff]  ;;  %v450_v35 = vld [vmem:[#allocation5 + $0x6d0] sm:$0xff] }
  0xa0   : > { %1430 = vmatpush1.bf16.msra.mxu0 %v1429_v48  ;;  %v344_v48 = vld [vmem:[#allocation5 + $0x390] sm:$0xff] }
  0xa1   : > { %1432 = vmatprep.subr.bf16.mxu0 %v1431_v49  ;;  %v347_v49 = vld [vmem:[#allocation5 + $0x3a8] sm:$0xff]  ;;  %v1473_v51 = vpack.c.bf16 %v344_v48, %v342_v47  ;;  %v434_v47 = vld [vmem:[#allocation5 + $0x650] sm:$0xff] }
  0xa2   : > { %v1475_v52 = vpack.c.bf16 %v349_v50, %v347_v49  ;;  %v372_v48 = vld [vmem:[#allocation5 + $0x468] sm:$0xff]  ;;  %v374_v49 = vld [vmem:[#allocation5 + $0x478] sm:$0xff] }
  0xa3   : > { %v437_v50 = vld [vmem:[#allocation5 + $0x668] sm:$0xff] }
  0xa4   : > { %1434 = vmatpush1.bf16.msra.mxu0 %v1433_v54  ;;  %v348_v54 = vld [vmem:[#allocation5 + $0x3b0] sm:$0xff] }
  0xa5   : > { %1436 = vmatprep.subr.bf16.mxu0 %v1435_v55  ;;  %v351_v55 = vld [vmem:[#allocation5 + $0x3c8] sm:$0xff]  ;;  %v1477_v57 = vpack.c.bf16 %v348_v54, %v346_v53  ;;  %v371_v54 = vld [vmem:[#allocation5 + $0x460] sm:$0xff] }
  0xa6   : > { %v1479_v58 = vpack.c.bf16 %v353_v56, %v351_v55  ;;  %v373_v55 = vld [vmem:[#allocation5 + $0x470] sm:$0xff]  ;;  %v2187_v56 = vpack.c.bf16 %v374_v49, %v372_v48  ;;  %v387_v48 = vld [vmem:[#allocation5 + $0x4e0] sm:$0xff] }
  0xa7   : > { %v389_v49 = vld [vmem:[#allocation5 + $0x4f0] sm:$0xff] }
  0xa8   : > { %1438 = vmatpush1.bf16.msra.mxu0 %v1437_v60  ;;  %v352_v60 = vld [vmem:[#allocation5 + $0x3d0] sm:$0xff] }
  0xa9   : > { %1440 = vmatprep.subr.bf16.mxu0 %v1439_v61  ;;  %v355_v61 = vld [vmem:[#allocation5 + $0x3e8] sm:$0xff]  ;;  %v1481_v41 = vpack.c.bf16 %v352_v60, %v350_v59  ;;  %v438_v59 = vld [vmem:[#allocation5 + $0x670] sm:$0xff] }
  0xaa   : > { %v1483_v63 = vpack.c.bf16 %v357_v62, %v355_v61  ;;  %v376_v60 = vld [vmem:[#allocation5 + $0x488] sm:$0xff]  ;;  %v378_v61 = vld [vmem:[#allocation5 + $0x498] sm:$0xff] }
  0xab   : > { %v441_v62 = vld [vmem:[#allocation5 + $0x688] sm:$0xff] }
  0xac   : > { %1442 = vmatpush1.bf16.msra.mxu0 %v1441_v1  ;;  %v356_v1 = vld [vmem:[#allocation5 + $0x3f0] sm:$0xff] }
  0xad   : > { %1444 = vmatprep.subr.bf16.mxu0 %v1443_v2  ;;  %v1485_v2 = vpack.c.bf16 %v356_v1, %v354_v0  ;;  %v375_v1 = vld [vmem:[#allocation5 + $0x480] sm:$0xff] }
  0xb0   : > { %1446 = vmatpush1.bf16.msra.mxu0 %v1445_v7 }
  0xb1   : > { %1448 = vmatprep.subr.bf16.mxu0 %v1447_v8 }
  0xb4   : > { %1450 = vmatpush1.bf16.msra.mxu0 %v1449_v13  ;;  %v361_v13 = vld [vmem:[#allocation5 + $0x410] sm:$0xff] }
  0xb5   : > { %1452 = vmatprep.subr.bf16.mxu0 %v1451_v14  ;;  %v425_v14 = vld [vmem:[#allocation5 + $0x608] sm:$0xff] }
  0xb8   : > { %1454 = vmatpush1.bf16.msra.mxu0 %v1453_v19 }
  0xb9   : > { %1456 = vmatprep.subr.bf16.mxu0 %v1455_v20  ;;  %v366_v20 = vld [vmem:[#allocation5 + $0x438] sm:$0xff] }
  0xba   : > { %v2159_v30 = vpack.c.bf16 %v366_v20, %v364_v18  ;;  %v384_v18 = vld [vmem:[#allocation5 + $0x4c8] sm:$0xff] }
  0xbb   : > { %v449_v20 = vld [vmem:[#allocation5 + $0x6c8] sm:$0xff] }
  0xbc   : > { %1458 = vmatpush1.bf16.msra.mxu0 %v1457_v25  ;;  %v2153_v25 = vpack.c.bf16 %v427_v15, %v425_v14 }
  0xbd   : > { %1460 = vmatprep.subr.bf16.mxu0 %v1459_v26  ;;  %v2155_v26 = vpack.c.bf16 %v361_v13, %v359_v12  ;;  %v379_v12 = vld [vmem:[#allocation5 + $0x4a0] sm:$0xff]  ;;  %v381_v13 = vld [vmem:[#allocation5 + $0x4b0] sm:$0xff] }
  0xc0   : > { %1462 = vmatpush1.bf16.msra.mxu0 %v1461_v31  ;;  %v2161_v31 = vpack.c.bf16 %v431_v22, %v429_v21  ;;  %v451_v21 = vld [vmem:[#allocation5 + $0x6d8] sm:$0xff]  ;;  %v2217_v22 = vpack.c.bf16 %v381_v13, %v379_v12  ;;  %v461_v12 = vld [vmem:[#allocation5 + $0x728] sm:$0xff] }
  0xc1   : > { %1464 = vmatprep.subr.bf16.mxu0 %v1463_v32  ;;  %v428_v32 = vld [vmem:[#allocation5 + $0x620] sm:$0xff]  ;;  %v463_v13 = vld [vmem:[#allocation5 + $0x738] sm:$0xff] }
  0xc2   : > { %v2171_v39 = vpack.c.bf16 %v430_v33, %v428_v32  ;;  %v2225_v33 = vpack.c.bf16 %v451_v21, %v449_v20  ;;  %v2261_v21 = vpack.c.bf16 %v463_v13, %v461_v12 }
  0xc4   : > { %1466 = vmatpush1.bf16.msra.mxu0 %v1465_v37  ;;  %v435_v37 = vld [vmem:[#allocation5 + $0x658] sm:$0xff]  ;;  %2490 = vst [vmem:[#allocation12_spill] sm:$0xff] %v2261_v21 }
  0xc5   : > { %1468 = vmatprep.subr.bf16.mxu0 %v1467_v38  ;;  %v2169_v38 = vpack.c.bf16 %v365_v29, %v363_v28  ;;  %v383_v28 = vld [vmem:[#allocation5 + $0x4c0] sm:$0xff]  ;;  %v385_v29 = vld [vmem:[#allocation5 + $0x4d0] sm:$0xff] }
  0xc8   : > { %1470 = vmatpush1.bf16.msra.mxu0 %v1469_v45  ;;  %v2177_v45 = vpack.c.bf16 %v435_v37, %v433_v36  ;;  %v388_v36 = vld [vmem:[#allocation5 + $0x4e8] sm:$0xff]  ;;  %v390_v37 = vld [vmem:[#allocation5 + $0x4f8] sm:$0xff] }
  0xc9   : > { %1472 = vmatprep.subr.bf16.mxu0 %v1471_v46  ;;  %v432_v46 = vld [vmem:[#allocation5 + $0x640] sm:$0xff] }
  0xca   : > { %v2183_v53 = vpack.c.bf16 %v434_v47, %v432_v46  ;;  %v2229_v46 = vpack.c.bf16 %v385_v29, %v383_v28  ;;  %v2231_v47 = vpack.c.bf16 %v450_v35, %v448_v34  ;;  %v460_v28 = vld [vmem:[#allocation5 + $0x720] sm:$0xff]  ;;  %v462_v29 = vld [vmem:[#allocation5 + $0x730] sm:$0xff]  ;;  %v400_v34 = vld [vmem:[#allocation5 + $0x548] sm:$0xff] }
  0xcb   : > { %v402_v35 = vld [vmem:[#allocation5 + $0x558] sm:$0xff] }
  0xcc   : > { %1474 = vmatpush1.bf16.msra.mxu0 %v1473_v51  ;;  %v439_v51 = vld [vmem:[#allocation5 + $0x678] sm:$0xff] }
  0xcd   : > { %1476 = vmatprep.subr.bf16.mxu0 %v1475_v52  ;;  %v2181_v52 = vpack.c.bf16 %v369_v43, %v367_v42  ;;  %v453_v42 = vld [vmem:[#allocation5 + $0x6e8] sm:$0xff]  ;;  %v455_v43 = vld [vmem:[#allocation5 + $0x6f8] sm:$0xff] }
  0xd0   : > { %1478 = vmatpush1.bf16.msra.mxu0 %v1477_v57  ;;  %v2189_v57 = vpack.c.bf16 %v439_v51, %v437_v50  ;;  %v2235_v50 = vpack.c.bf16 %v390_v37, %v388_v36  ;;  %v2237_v51 = vpack.c.bf16 %v455_v43, %v453_v42  ;;  %v465_v36 = vld [vmem:[#allocation5 + $0x748] sm:$0xff]  ;;  %v467_v37 = vld [vmem:[#allocation5 + $0x758] sm:$0xff]  ;;  %v2267_v43 = vpack.c.bf16 %v462_v29, %v460_v28 }
  0xd1   : > { %1480 = vmatprep.subr.bf16.mxu0 %v1479_v58  ;;  %v436_v58 = vld [vmem:[#allocation5 + $0x660] sm:$0xff]  ;;  %v408_v28 = vld [vmem:[#allocation5 + $0x588] sm:$0xff]  ;;  %v410_v29 = vld [vmem:[#allocation5 + $0x598] sm:$0xff] }
  0xd2   : > { %v2195_v0 = vpack.c.bf16 %v438_v59, %v436_v58  ;;  %v392_v58 = vld [vmem:[#allocation5 + $0x508] sm:$0xff]  ;;  %v394_v59 = vld [vmem:[#allocation5 + $0x518] sm:$0xff]  ;;  %2491 = vst [vmem:[#allocation13_spill] sm:$0xff] %v2267_v43 }
  0xd3   : > { %v2247_v5 = vpack.c.bf16 %v394_v59, %v392_v58  ;;  %v464_v58 = vld [vmem:[#allocation5 + $0x740] sm:$0xff]  ;;  %v466_v59 = vld [vmem:[#allocation5 + $0x750] sm:$0xff] }
  0xd4   : > { %1482 = vmatpush1.bf16.msra.mxu0 %v1481_v41  ;;  %v443_v41 = vld [vmem:[#allocation5 + $0x698] sm:$0xff] }
  0xd5   : > { %1484 = vmatprep.subr.bf16.mxu0 %v1483_v63  ;;  %v2193_v63 = vpack.c.bf16 %v373_v55, %v371_v54  ;;  %v2201_v4 = vpack.c.bf16 %v443_v41, %v441_v62  ;;  %v452_v54 = vld [vmem:[#allocation5 + $0x6e0] sm:$0xff]  ;;  %v454_v55 = vld [vmem:[#allocation5 + $0x6f0] sm:$0xff]  ;;  %v2241_v62 = vpack.c.bf16 %v389_v49, %v387_v48 }
  0xd6   : > { %v2243_v41 = vpack.c.bf16 %v454_v55, %v452_v54  ;;  %v399_v48 = vld [vmem:[#allocation5 + $0x540] sm:$0xff]  ;;  %v401_v49 = vld [vmem:[#allocation5 + $0x550] sm:$0xff]  ;;  %v2271_v54 = vpack.c.bf16 %v402_v35, %v400_v34  ;;  %v2273_v55 = vpack.c.bf16 %v467_v37, %v465_v36  ;;  %v473_v34 = vld [vmem:[#allocation5 + $0x788] sm:$0xff] }
  0xd7   : > { %v475_v35 = vld [vmem:[#allocation5 + $0x798] sm:$0xff] }
  0xd8   : > { %1486 = vmatpush1.bf16.msra.mxu0 %v1485_v2  ;;  %v377_v2 = vld [vmem:[#allocation5 + $0x490] sm:$0xff]  ;;  %2492 = vst [vmem:[#allocation14_spill] sm:$0xff] %v2273_v55 }
  0xd9   : > { %v2205_v10 = vpack.c.bf16 %v377_v2, %v375_v1  ;;  %v391_v1 = vld [vmem:[#allocation5 + $0x500] sm:$0xff]  ;;  %v393_v2 = vld [vmem:[#allocation5 + $0x510] sm:$0xff] }
  0xdb   : > { %632 = vmatmul.mubr.f32.vlgmr.msra.gmra.mrb[2].mxu0 %v2132_v40  ;;  %v1344_v40 = vld [vmem:[%s2458_s2 + $0x8] sm:$0xff] }
  0xdc   : > { %860 = vmatprep.mubr.f32.mxu0 %v1946_v3 }
 0x16e   : > { %v562_v7 = vpop.f32.mrb[0].mxu0 }
 0x16f   : > { %v564_v8 = vpop.f32.mrb[1].mxu0 }
 0x170   : > { %642 = vmatprep.subr.mxu1 %v564_v8  ;;  %796 = vmatprep.subr.mxu0 %v564_v8  ;;  %v382_v8 = vld [vmem:[#allocation5 + $0x4b8] sm:$0xff] }
 0x171   : > { %643 = vmatpush1.msra.mxu1 %v562_v7  ;;  %797 = vmatpush1.msra.mxu0 %v562_v7  ;;  %v380_v7 = vld [vmem:[#allocation5 + $0x4a8] sm:$0xff] }
 0x172   : > { %1348 = vmatmul.mubr.msk.f32.vlgmr.msra.gmra.mrb[4].mxu0 %vm638_vm0, %v1344_v40  ;;  %1346 = vmatmul.mubr.msk.f32.vlgmr.msra.gmra.mrb[0].mxu1 %vm638_vm0, %v488_v9  ;;  %v2211_v14 = vpack.c.bf16 %v382_v8, %v380_v7  ;;  %v456_v7 = vld [vmem:[#allocation5 + $0x700] sm:$0xff]  ;;  %v458_v8 = vld [vmem:[#allocation5 + $0x710] sm:$0xff] }
 0x173   : > { %780 = vmatprep.mubr.f32.mxu1 %v1946_v3  ;;  %931 = vmatprep.mubr.f32.mxu0 %v1946_v3  ;;  %v2199_v3 = vpack.c.bf16 %v378_v61, %v376_v60  ;;  %v457_v60 = vld [vmem:[#allocation5 + $0x708] sm:$0xff]  ;;  %v459_v61 = vld [vmem:[#allocation5 + $0x718] sm:$0xff] }
 0x174   : > { %v2249_v6 = vpack.c.bf16 %v459_v61, %v457_v60  ;;  %v404_v60 = vld [vmem:[#allocation5 + $0x568] sm:$0xff]  ;;  %v406_v61 = vld [vmem:[#allocation5 + $0x578] sm:$0xff] }
 0x175   : > { %v2283_v12 = vpack.c.bf16 %v406_v61, %v404_v60  ;;  %v472_v60 = vld [vmem:[#allocation5 + $0x780] sm:$0xff]  ;;  %v474_v61 = vld [vmem:[#allocation5 + $0x790] sm:$0xff] }
 0x1ae   : > { %v633_v19 = vpop.f32.mrb[2].mxu0 }
 0x1af   : > { %v635_v23 = vpop.f32.mrb[3].mxu0 }
 0x1b0   : > { %716 = vmatprep.subr.mxu1 %v635_v23  ;;  %867 = vmatprep.subr.mxu0 %v635_v23  ;;  %v2219_v23 = vpack.c.bf16 %v446_v17, %v444_v16  ;;  %v2253_v16 = vpack.c.bf16 %v393_v2, %v391_v1  ;;  %v2255_v17 = vpack.c.bf16 %v458_v8, %v456_v7  ;;  %v469_v1 = vld [vmem:[#allocation5 + $0x768] sm:$0xff]  ;;  %v471_v2 = vld [vmem:[#allocation5 + $0x778] sm:$0xff] }
 0x1b1   : > { %717 = vmatpush1.msra.mxu1 %v633_v19  ;;  %868 = vmatpush1.msra.mxu0 %v633_v19  ;;  %v386_v19 = vld [vmem:[#allocation5 + $0x4d8] sm:$0xff]  ;;  %v2277_v7 = vpack.c.bf16 %v401_v49, %v399_v48  ;;  %v2279_v8 = vpack.c.bf16 %v466_v59, %v464_v58  ;;  %v2285_v13 = vpack.c.bf16 %v471_v2, %v469_v1  ;;  %v407_v48 = vld [vmem:[#allocation5 + $0x580] sm:$0xff]  ;;  %v409_v49 = vld [vmem:[#allocation5 + $0x590] sm:$0xff] }
 0x1b2   : > { %1347 = vmatmul.mubr.msk.f32.vlgmr.msra.gmra.mrb[2].mxu1 %vm638_vm0, %v1344_v40  ;;  %1349 = vmatmul.mubr.msk.f32.vlgmr.msra.gmra.mrb[4].mxu0 %vm638_vm0, %v488_v9  ;;  %v445_v40 = vld [vmem:[#allocation5 + $0x6a8] sm:$0xff]  ;;  %v447_v9 = vld [vmem:[#allocation5 + $0x6b8] sm:$0xff]  ;;  %v2223_v32 = vpack.c.bf16 %v386_v19, %v384_v18  ;;  %2489 = vst [vmem:[#allocation11_spill] sm:$0xff] %v2255_v17  ;;  %v395_v18 = vld [vmem:[#allocation5 + $0x520] sm:$0xff]  ;;  %v2295_v58 = vpack.c.bf16 %v410_v29, %v408_v28 }
 0x1b3   : > { %1488 = vmatprep.subr.bf16.mxu1 %v2151_v24  ;;  %1552 = vmatprep.subr.bf16.mxu0 %v2153_v25  ;;  %v2213_v15 = vpack.c.bf16 %v447_v9, %v445_v40  ;;  %v396_v40 = vld [vmem:[#allocation5 + $0x528] sm:$0xff]  ;;  %v398_v9 = vld [vmem:[#allocation5 + $0x538] sm:$0xff]  ;;  %v397_v19 = vld [vmem:[#allocation5 + $0x530] sm:$0xff]  ;;  %2493 = vst [vmem:[#allocation15_spill] sm:$0xff] %v2279_v8  ;;  %v2297_v59 = vpack.c.bf16 %v475_v35, %v473_v34 }
 0x1b4   : > { %1490 = vmatpush1.bf16.msra.mxu1 %v2155_v26  ;;  %1554 = vmatpush1.bf16.msra.mxu0 %v2157_v27  ;;  %v2259_v20 = vpack.c.bf16 %v398_v9, %v396_v40  ;;  %v2265_v42 = vpack.c.bf16 %v397_v19, %v395_v18  ;;  %v403_v40 = vld [vmem:[#allocation5 + $0x560] sm:$0xff]  ;;  %v405_v9 = vld [vmem:[#allocation5 + $0x570] sm:$0xff]  ;;  %2494 = vst [vmem:[#allocation16_spill] sm:$0xff] %v2285_v13  ;;  %v412_v1 = vld [vmem:[#allocation5 + $0x5a8] sm:$0xff] }
 0x1b5   : > { %1492 = vmatprep.subr.bf16.mxu1 %v2159_v30  ;;  %1556 = vmatprep.subr.bf16.mxu0 %v2161_v31  ;;  %v468_v18 = vld [vmem:[#allocation5 + $0x760] sm:$0xff]  ;;  %v470_v19 = vld [vmem:[#allocation5 + $0x770] sm:$0xff]  ;;  %v2289_v36 = vpack.c.bf16 %v405_v9, %v403_v40  ;;  %2496 = vst [vmem:[#allocation18_spill] sm:$0xff] %v2297_v59  ;;  %v414_v2 = vld [vmem:[#allocation5 + $0x5b8] sm:$0xff]  ;;  %v2301_v40 = vpack.c.bf16 %v409_v49, %v407_v48 }
 0x1b6   : > { %v2291_v37 = vpack.c.bf16 %v470_v19, %v468_v18  ;;  %v2303_v9 = vpack.c.bf16 %v474_v61, %v472_v60  ;;  %v411_v18 = vld [vmem:[#allocation5 + $0x5a0] sm:$0xff]  ;;  %v413_v19 = vld [vmem:[#allocation5 + $0x5b0] sm:$0xff]  ;;  %v2307_v28 = vpack.c.bf16 %v414_v2, %v412_v1 }
 0x1b7   : > { %v476_v34 = vld [vmem:[#allocation5 + $0x7a0] sm:$0xff]  ;;  %v478_v35 = vld [vmem:[#allocation5 + $0x7b0] sm:$0xff]  ;;  %v2313_v48 = vpack.c.bf16 %v413_v19, %v411_v18  ;;  %v422_v19 = vld [vmem:[#allocation5 + $0x5f8] sm:$0xff] }
 0x1b8   : > { %1494 = vmatpush1.bf16.msra.mxu1 %v2169_v38  ;;  %1558 = vmatpush1.bf16.msra.mxu0 %v2171_v39  ;;  %2495 = vst [vmem:[#allocation17_spill] sm:$0xff] %v2291_v37  ;;  %2497 = vst [vmem:[#allocation19_spill] sm:$0xff] %v2303_v9  ;;  %v2315_v49 = vpack.c.bf16 %v478_v35, %v476_v34  ;;  %v417_v60 = vld [vmem:[#allocation5 + $0x5d0] sm:$0xff]  ;;  %v480_v2 = vld [vmem:[#allocation5 + $0x7c0] sm:$0xff] }
 0x1b9   : > { %1496 = vmatprep.subr.bf16.mxu1 %v2175_v44  ;;  %1560 = vmatprep.subr.bf16.mxu0 %v2177_v45  ;;  %v482_v18 = vld [vmem:[#allocation5 + $0x7d0] sm:$0xff]  ;;  %v484_v35 = vld [vmem:[#allocation5 + $0x7e0] sm:$0xff] }
 0x1ba   : > { %2499 = vst [vmem:[#allocation21_spill] sm:$0xff] %v2315_v49 }
 0x1bc   : > { %1498 = vmatpush1.bf16.msra.mxu1 %v2181_v52  ;;  %1562 = vmatpush1.bf16.msra.mxu0 %v2183_v53 }
 0x1bd   : > { %1500 = vmatprep.subr.bf16.mxu1 %v2187_v56  ;;  %1564 = vmatprep.subr.bf16.mxu0 %v2189_v57 }
 0x1c0   : > { %1502 = vmatpush1.bf16.msra.mxu1 %v2193_v63  ;;  %1566 = vmatpush1.bf16.msra.mxu0 %v2195_v0 }
 0x1c1   : > { %1504 = vmatprep.subr.bf16.mxu1 %v2199_v3  ;;  %1568 = vmatprep.subr.bf16.mxu0 %v2201_v4 }
 0x1c4   : > { %1506 = vmatpush1.bf16.msra.mxu1 %v2205_v10  ;;  %1570 = vmatpush1.bf16.msra.mxu0 %v2207_v11 }
 0x1c5   : > { %1508 = vmatprep.subr.bf16.mxu1 %v2211_v14  ;;  %1572 = vmatprep.subr.bf16.mxu0 %v2213_v15 }
 0x1c8   : > { %1510 = vmatpush1.bf16.msra.mxu1 %v2217_v22  ;;  %1574 = vmatpush1.bf16.msra.mxu0 %v2219_v23 }
 0x1c9   : > { %1512 = vmatprep.subr.bf16.mxu1 %v2223_v32  ;;  %1576 = vmatprep.subr.bf16.mxu0 %v2225_v33 }
 0x1cc   : > { %1514 = vmatpush1.bf16.msra.mxu1 %v2229_v46  ;;  %1578 = vmatpush1.bf16.msra.mxu0 %v2231_v47 }
 0x1cd   : > { %1516 = vmatprep.subr.bf16.mxu1 %v2235_v50  ;;  %1580 = vmatprep.subr.bf16.mxu0 %v2237_v51 }
 0x1d0   : > { %1518 = vmatpush1.bf16.msra.mxu1 %v2241_v62  ;;  %1582 = vmatpush1.bf16.msra.mxu0 %v2243_v41 }
 0x1d1   : > { %1520 = vmatprep.subr.bf16.mxu1 %v2247_v5  ;;  %1584 = vmatprep.subr.bf16.mxu0 %v2249_v6 }
 0x1d4   : > { %1522 = vmatpush1.bf16.msra.mxu1 %v2253_v16  ;;  %1586 = vmatpush1.bf16.msra.mxu0 %v2255_v17 }
 0x1d5   : > { %1524 = vmatprep.subr.bf16.mxu1 %v2259_v20  ;;  %1588 = vmatprep.subr.bf16.mxu0 %v2261_v21  ;;  %v481_v21 = vld [vmem:[#allocation5 + $0x7c8] sm:$0xff] }
 0x1d8   : > { %1526 = vmatpush1.bf16.msra.mxu1 %v2265_v42  ;;  %1590 = vmatpush1.bf16.msra.mxu0 %v2267_v43  ;;  %v418_v43 = vld [vmem:[#allocation5 + $0x5d8] sm:$0xff] }
 0x1d9   : > { %1528 = vmatprep.subr.bf16.mxu1 %v2271_v54  ;;  %1592 = vmatprep.subr.bf16.mxu0 %v2273_v55  ;;  %v477_v55 = vld [vmem:[#allocation5 + $0x7a8] sm:$0xff] }
 0x1dc   : > { %1530 = vmatpush1.bf16.msra.mxu1 %v2277_v7  ;;  %1594 = vmatpush1.bf16.msra.mxu0 %v2279_v8  ;;  %v479_v8 = vld [vmem:[#allocation5 + $0x7b8] sm:$0xff] }
 0x1dd   : > { %1532 = vmatprep.subr.bf16.mxu1 %v2283_v12  ;;  %1596 = vmatprep.subr.bf16.mxu0 %v2285_v13  ;;  %v2309_v29 = vpack.c.bf16 %v479_v8, %v477_v55  ;;  %v416_v13 = vld [vmem:[#allocation5 + $0x5c8] sm:$0xff]  ;;  %v415_v8 = vld [vmem:[#allocation5 + $0x5c0] sm:$0xff] }
 0x1de   : > { %v2319_v55 = vpack.c.bf16 %v418_v43, %v416_v13  ;;  %v2325_v1 = vpack.c.bf16 %v417_v60, %v415_v8  ;;  %v2330_v43 = vpack.c.bf16 %v482_v18, %v480_v2  ;;  %v487_v13 = vld [vmem:[#allocation5 + $0x7f8] sm:$0xff]  ;;  %v419_v60 = vld [vmem:[#allocation5 + $0x5e0] sm:$0xff] }
 0x1df   : > { %2498 = vst [vmem:[#allocation20_spill] sm:$0xff] %v2309_v29 }
 0x1e0   : > { %1534 = vmatpush1.bf16.msra.mxu1 %v2289_v36  ;;  %1598 = vmatpush1.bf16.msra.mxu0 %v2291_v37  ;;  %v483_v37 = vld [vmem:[#allocation5 + $0x7d8] sm:$0xff]  ;;  %2501 = vst [vmem:[#allocation23_spill] sm:$0xff] %v2330_v43 }
 0x1e1   : > { %1536 = vmatprep.subr.bf16.mxu1 %v2295_v58  ;;  %1600 = vmatprep.subr.bf16.mxu0 %v2297_v59  ;;  %v2321_v61 = vpack.c.bf16 %v483_v37, %v481_v21  ;;  %v485_v21 = vld [vmem:[#allocation5 + $0x7e8] sm:$0xff] }
 0x1e2   : > { %v420_v37 = vld [vmem:[#allocation5 + $0x5e8] sm:$0xff]  ;;  %v2333_v34 = vpack.c.bf16 %v487_v13, %v485_v21  ;;  %v792_v21 = vpop.permute.xlu0 %791 }
 0x1e3   : > { %2500 = vst [vmem:[#allocation22_spill] sm:$0xff] %v2321_v61  ;;  %v1547_v8 = vpack.c.bf16 %v422_v19, %v420_v37 }
 0x1e4   : > { %1538 = vmatpush1.bf16.msra.mxu1 %v2301_v40  ;;  %1602 = vmatpush1.bf16.msra.mxu0 %v2303_v9  ;;  %2502 = vst [vmem:[#allocation24_spill] sm:$0xff] %v2333_v34 }
 0x1e5   : > { %1540 = vmatprep.subr.bf16.mxu1 %v2307_v28  ;;  %1604 = vmatprep.subr.bf16.mxu0 %v2309_v29  ;;  %v486_v29 = vld [vmem:[#allocation5 + $0x7f0] sm:$0xff] }
 0x1e6   : > { %v2336_v9 = vpack.c.bf16 %v486_v29, %v484_v35  ;;  %v941_v13 = vpop.permute.xlu0 %940 }
 0x1e8   : > { %1542 = vmatpush1.bf16.msra.mxu1 %v2313_v48  ;;  %1606 = vmatpush1.bf16.msra.mxu0 %v2315_v49  ;;  %v421_v49 = vld [vmem:[#allocation5 + $0x5f0] sm:$0xff] }
 0x1e9   : > { %1544 = vmatprep.subr.bf16.mxu1 %v2319_v55  ;;  %1608 = vmatprep.subr.bf16.mxu0 %v2321_v61  ;;  %v1549_v61 = vpack.c.bf16 %v421_v49, %v419_v60 }
 0x1ec   : > { %1546 = vmatpush1.bf16.msra.mxu1 %v2325_v1  ;;  %1610 = vmatpush1.bf16.msra.mxu0 %v2330_v43 }
 0x1ed   : > { %1612 = vmatprep.subr.bf16.mxu0 %v2333_v34  ;;  %1548 = vmatprep.subr.bf16.mxu1 %v1547_v8 }
 0x1f0   : > { %1550 = vmatpush1.bf16.msra.mxu1 %v1549_v61  ;;  %1614 = vmatpush1.bf16.msra.mxu0 %v2336_v9 }
 0x1f1   : > { %1616 = vmatprep.subr.bf16.mxu1 %v2151_v24  ;;  %v2503_v24 = vld [vmem:[#allocation11_spill] sm:$0xff] }
 0x245   : > { %v708_v2 = vpop.f32.mrb[0].mxu1 }
 0x246   : > { %v710_v18 = vpop.f32.mrb[1].mxu1 }
 0x285   : > { %v782_v43 = vpop.f32.mrb[2].mxu1  ;;  %v933_v37 = vpop.f32.mrb[4].mxu0 }
 0x286   : > { %v787_v19 = vsub.f32 %v708_v2, %v782_v43  ;;  %v784_v59 = vpop.f32.mrb[3].mxu1  ;;  %v943_v17 = vadd.f32 %v941_v13, %v933_v37  ;;  %v935_v49 = vpop.f32.mrb[5].mxu0 }
 0x287   : > { %v788_v60 = vsub.f32 %v710_v18, %v784_v59  ;;  %v944_v34 = vadd.f32 %v941_v13, %v935_v49 }
 0x288   : > { %v2340_v35 = vadd.f32 %v792_v21, %v787_v19 }
 0x289   : > { %v795_v29 = vadd.f32 %v792_v21, %v788_v60  ;;  %1080 = vmatprep.mubr.f32.mxu0 %v944_v34 }
 0x28a   : > { %1081 = vmatmul.mubr.f32.vlgmr.msra.gmra.mrb[6].mxu0 %v943_v17 }
 0x28b   : > { %1009 = vmatprep.mubr.f32.mxu1 %v795_v29 }
 0x28c   : > { %1010 = vmatmul.mubr.f32.vlgmr.msra.gmra.mrb[4].mxu1 %v2340_v35 }
 0x28d   : > { %1618 = vmatpush1.bf16.msra.mxu1 %v2155_v26  ;;  %1155 = vmatprep.mubr.f32.mxu1 %v944_v34  ;;  %v2505_v26 = vld [vmem:[#allocation13_spill] sm:$0xff] }
 0x28e   : > { %1620 = vmatprep.subr.bf16.mxu1 %v2159_v30  ;;  %v2507_v30 = vld [vmem:[#allocation15_spill] sm:$0xff] }
 0x291   : > { %1622 = vmatpush1.bf16.msra.mxu1 %v2169_v38  ;;  %v2509_v38 = vld [vmem:[#allocation17_spill] sm:$0xff] }
 0x292   : > { %1624 = vmatprep.subr.bf16.mxu1 %v2175_v44  ;;  %v2511_v44 = vld [vmem:[#allocation19_spill] sm:$0xff] }
 0x295   : > { %1626 = vmatpush1.bf16.msra.mxu1 %v2181_v52  ;;  %v2513_v52 = vld [vmem:[#allocation21_spill] sm:$0xff] }
 0x296   : > { %1628 = vmatprep.subr.bf16.mxu1 %v2187_v56  ;;  %v2515_v56 = vld [vmem:[#allocation23_spill] sm:$0xff] }
 0x299   : > { %1630 = vmatpush1.bf16.msra.mxu1 %v2193_v63 }
 0x29a   : > { %1632 = vmatprep.subr.bf16.mxu1 %v2199_v3 }
 0x29d   : > { %1634 = vmatpush1.bf16.msra.mxu1 %v2205_v10 }
 0x29e   : > { %1636 = vmatprep.subr.bf16.mxu1 %v2211_v14 }
 0x2a1   : > { %1638 = vmatpush1.bf16.msra.mxu1 %v2217_v22 }
 0x2a2   : > { %1640 = vmatprep.subr.bf16.mxu1 %v2223_v32 }
 0x2a5   : > { %1642 = vmatpush1.bf16.msra.mxu1 %v2229_v46 }
 0x2a6   : > { %1644 = vmatprep.subr.bf16.mxu1 %v2235_v50 }
 0x2a9   : > { %1646 = vmatpush1.bf16.msra.mxu1 %v2241_v62 }
 0x2aa   : > { %1648 = vmatprep.subr.bf16.mxu1 %v2247_v5 }
 0x2ad   : > { %1650 = vmatpush1.bf16.msra.mxu1 %v2253_v16 }
 0x2ae   : > { %1652 = vmatprep.subr.bf16.mxu1 %v2259_v20 }
 0x2b1   : > { %1654 = vmatpush1.bf16.msra.mxu1 %v2265_v42 }
 0x2b2   : > { %1656 = vmatprep.subr.bf16.mxu1 %v2271_v54 }
 0x2b5   : > { %1658 = vmatpush1.bf16.msra.mxu1 %v2277_v7 }
 0x2b6   : > { %1660 = vmatprep.subr.bf16.mxu1 %v2283_v12 }
 0x2b9   : > { %1662 = vmatpush1.bf16.msra.mxu1 %v2289_v36 }
 0x2ba   : > { %1664 = vmatprep.subr.bf16.mxu1 %v2295_v58 }
 0x2bd   : > { %1666 = vmatpush1.bf16.msra.mxu1 %v2301_v40 }
 0x2be   : > { %1668 = vmatprep.subr.bf16.mxu1 %v2307_v28 }
 0x2c1   : > { %1670 = vmatpush1.bf16.msra.mxu1 %v2313_v48 }
 0x2c2   : > { %1672 = vmatprep.subr.bf16.mxu1 %v2319_v55 }
 0x2c5   : > { %1674 = vmatpush1.bf16.msra.mxu1 %v2325_v1 }
 0x2c6   : > { %1676 = vmatprep.subr.bf16.mxu1 %v1547_v8 }
 0x2c9   : > { %1678 = vmatpush1.bf16.msra.mxu1 %v1549_v61 }
 0x2ca   : > { %1680 = vmatprep.subr.bf16.mxu1 %v2153_v25  ;;  %v2504_v25 = vld [vmem:[#allocation12_spill] sm:$0xff] }
 0x2cc   : > { %1156 = vmatmul.mubr.f32.vlgmr.msra.gmra.mrb[6].mxu1 %v943_v17 }
 0x2cd   : > { %1682 = vmatpush1.bf16.msra.mxu1 %v2157_v27  ;;  %1226 = vmatprep.mubr.f32.mxu1 %v795_v29  ;;  %v2506_v27 = vld [vmem:[#allocation14_spill] sm:$0xff] }
 0x2ce   : > { %1684 = vmatprep.subr.bf16.mxu1 %v2161_v31  ;;  %v2508_v31 = vld [vmem:[#allocation16_spill] sm:$0xff] }
 0x2d1   : > { %1686 = vmatpush1.bf16.msra.mxu1 %v2171_v39  ;;  %v2510_v39 = vld [vmem:[#allocation18_spill] sm:$0xff] }
 0x2d2   : > { %1688 = vmatprep.subr.bf16.mxu1 %v2177_v45  ;;  %v2512_v45 = vld [vmem:[#allocation20_spill] sm:$0xff] }
 0x2d5   : > { %1690 = vmatpush1.bf16.msra.mxu1 %v2183_v53  ;;  %v2514_v53 = vld [vmem:[#allocation22_spill] sm:$0xff] }
 0x2d6   : > { %1692 = vmatprep.subr.bf16.mxu1 %v2189_v57  ;;  %v2516_v57 = vld [vmem:[#allocation24_spill] sm:$0xff] }
 0x2d9   : > { %1694 = vmatpush1.bf16.msra.mxu1 %v2195_v0 }
 0x2da   : > { %1696 = vmatprep.subr.bf16.mxu1 %v2201_v4 }
 0x2dd   : > { %1698 = vmatpush1.bf16.msra.mxu1 %v2207_v11 }
 0x2de   : > { %1700 = vmatprep.subr.bf16.mxu1 %v2213_v15 }
 0x2e1   : > { %1702 = vmatpush1.bf16.msra.mxu1 %v2219_v23 }
 0x2e2   : > { %1704 = vmatprep.subr.bf16.mxu1 %v2225_v33 }
 0x2e5   : > { %1706 = vmatpush1.bf16.msra.mxu1 %v2231_v47 }
 0x2e6   : > { %1708 = vmatprep.subr.bf16.mxu1 %v2237_v51 }
 0x2e9   : > { %1710 = vmatpush1.bf16.msra.mxu1 %v2243_v41 }
 0x2ea   : > { %1712 = vmatprep.subr.bf16.mxu1 %v2249_v6 }
 0x2ed   : > { %1714 = vmatpush1.bf16.msra.mxu1 %v2503_v24 }
 0x2ee   : > { %1716 = vmatprep.subr.bf16.mxu1 %v2504_v25 }
 0x2f1   : > { %1718 = vmatpush1.bf16.msra.mxu1 %v2505_v26 }
 0x2f2   : > { %1720 = vmatprep.subr.bf16.mxu1 %v2506_v27 }
 0x2f5   : > { %1722 = vmatpush1.bf16.msra.mxu1 %v2507_v30 }
 0x2f6   : > { %1724 = vmatprep.subr.bf16.mxu1 %v2508_v31 }
 0x2f9   : > { %1726 = vmatpush1.bf16.msra.mxu1 %v2509_v38 }
 0x2fa   : > { %1728 = vmatprep.subr.bf16.mxu1 %v2510_v39 }
 0x2fd   : > { %1730 = vmatpush1.bf16.msra.mxu1 %v2511_v44 }
 0x2fe   : > { %1732 = vmatprep.subr.bf16.mxu1 %v2512_v45 }
 0x301   : > { %1734 = vmatpush1.bf16.msra.mxu1 %v2513_v52 }
 0x302   : > { %1736 = vmatprep.subr.bf16.mxu1 %v2514_v53 }
 0x305   : > { %1738 = vmatpush1.bf16.msra.mxu1 %v2515_v56 }
 0x306   : > { %1740 = vmatprep.subr.bf16.mxu1 %v2516_v57 }
 0x309   : > { %1742 = vmatpush1.bf16.msra.mxu1 %v2336_v9 }
 0x30c   : > { %1227 = vmatmul.mubr.f32.vlgmr.msra.gmra.mrb[6].mxu1 %v2340_v35 }
 0x35d   : > { %v1082_v63 = vpop.f32.mrb[6].mxu0 }
 0x35e   : > { %v1084_v0 = vpop.f32.mrb[7].mxu0 }
 0x35f   : > { %v1011_v3 = vpop.f32.mrb[4].mxu1 }
 0x360   : > { %v1087_v4 = vsub.f32 %v1011_v3, %v1082_v63  ;;  %v1013_v10 = vpop.f32.mrb[5].mxu1 }
 0x361   : > { %v1088_v11 = vsub.f32 %v1013_v10, %v1084_v0 }
 0x362   : > { %1089 = vst [vmem:[%s228_s5] sm:$0xff] %v1087_v4 }
 0x363   : > { %1090 = vst [vmem:[%s228_s5 + $0x8] sm:$0xff] %v1088_v11 }
 0x3df   : > { %v1228_v14 = vpop.f32.mrb[6].mxu1 }
 0x3e0   : > { %1350 = vst [vmem:[%s228_s5 + $0x10] sm:$0xff] %v1228_v14  ;;  %v1230_v15 = vpop.f32.mrb[7].mxu1 }
 0x3e1   : > { %1351 = vst [vmem:[%s228_s5 + $0x18] sm:$0xff] %v1230_v15 }
 0x3e2   : > { %1883 = shalt.err (!%p1880_p7)
}
 0x3e3   : > { %s1884_s28 = scalar_lea.hbm %s2412_s12, 512  ;;  %s1888_s14 = scalar_lea.hbm %s2460_s4, 1024 }
 0x3e4   : > { %p1885_p9 = scmp.ne.s32.totalorder %s2412_s12, %s1884_s28  ;;  %p1889_p0 = scmp.lt.u32.totalorder %s2412_s12, %s2460_s4 }
 0x3e5   : > { %p1890_p11 = scmp.lt.u32.totalorder %s1888_s14, %s1884_s28  ;;  %p1892_p4 = scmp.lt.u32.totalorder %s1884_s28, %s2412_s12 }
 0x3e6   : > { %p1886_p2 = pnand %p1885_p9, %p2068_p12 }
 0x3e7   : > { %p1891_p1 = por %p1890_p11, %p1889_p0 }
 0x3e8   : > { %p1887_p5 = pneg %p1886_p2 }
 0x3e9   : > { %p1893_p6 = por %p1892_p4, %p1891_p1 }
 0x3eb   : > { %p1894_p8 = pnand %p1893_p6, %p1887_p5 }
 0x3ed   : > { %1897 = shalt.err (!%p1894_p8)
}
 0x3ee   : > { %s1949_s5 = smov 256   ;;  %s1950_s26 = smov 512  }
 0x3ef   : > { %s1951_s8 = smov 16  }
 0x3f0   : > { %1753 = dma.vmem_to_hbm [thread:$0]  (%p2068_p12), %s2407_s7, 512, %s2412_s12, %s1237_s13, %s1949_s5, %s1950_s26, %s1951_s8  }
 0x3f1 PF: > { %s1265_s11 = sand.u32 1, %s1928_s15   ;;  %p2517_p10 = scmp.ne.s32.totalorder %s2479_s22, 0 }
 0x3f2   : > { %p2518_p13 = scmp.ge.s32.totalorder %s1940_s18, 2  ;;  %s1266_s21 = scalar_lea.sflag [#allocation4], %s1265_s11 }
 0x3f4   : > { %p1764_p3 = pnand %p2518_p13, %p2517_p10 }
 0x3f6   : > { %1923 = dma.done.wait (!%p1764_p3), %s1266_s21, 512  }
 0x3f7   : > { %1925 = vsyncadd (!%p1764_p3), %s1266_s21, 4294966784  ;;  %p18_p7 = scmp.ge.s32.totalorder %s2033_s27, 4   ;;  %s2519_s15 = smov %s1932_s16 }
 0x3f8   : > { %s2520_s16 = smov %s1936_s17  ;;  %s2521_s17 = smov %s2064_s24 }
 0x3f9   : > { %s2522_s18 = smov %s2033_s27  ;;  %20 = sbr.rel (!%p18_p7) target bundleno = 6 (0x6), region = 91 }
 0x400   :  { %1271 = vsyncpa [#allocation3], 1 }
 0x401   :  { %1273 = vsyncpa [#allocation3 + $0x1], 1 }
 0x402   :  { %1274 = vsyncpa [#allocation6], 1 }
 0x403   :  { %1275 = vsyncpa [#allocation4], 1 }
 0x404   :  { %1277 = vsyncpa [#allocation4 + $0x1], 1 }

</bundles_post_ra>
